<compile_context>
chip_gen: v5e
topology: v5e:2x2
jax: 0.10.0
libtpu: 0.0.40
codegen_flags: <defaults>
</compile_context>

<pallas_src>
import jax
import jax.numpy as jnp
from jax import lax
from jax.experimental import pallas as pl
from jax.experimental.pallas import tpu as pltpu


# ---------------------------------------------------------------------------
# Config (small, deterministic)
# ---------------------------------------------------------------------------
N_TOKEN = 32
D_EMBED = 16
HIDDEN = 32
N_LAYER = 2
DROPOUT = 0.0
BATCH = 2
SEQ = 8
VPAD = 128          # lane-padded head width (>= N_TOKEN, multiple of 128)


# ---------------------------------------------------------------------------
# Fused Pallas kernel: embedding + stacked LSTM + linear head, one call
# ---------------------------------------------------------------------------
def _make_fused_kernel(n_layer, seq_len, batch, hidden, n_token, v_pad):
    """Builds the fused forward kernel.

    Ref layout (inputs, in order):
      tok        (T*B, 1)  int32   time-major flattened tokens
      fused_w0   (V, 4H)   f32     emb @ wih0^T (embedding fused into layer-0)
      b0         (1, 4H)   f32     b_ih0 + b_hh0
      whh0       (H, 4H)   f32     layer-0 hidden->gate weights (pre-transposed)
      per layer l >= 1:
        wih_l    (H, 4H)   f32
        whh_l    (H, 4H)   f32
        b_l      (1, 4H)   f32
      lin_w_pad  (H, VPAD) f32     head weights, zero-padded to 128 lanes
      lin_b_pad  (1, VPAD) f32
      h0, c0     (L, B, H) f32     initial LSTM state
    Outputs:
      logits_pad (T*B, VPAD) f32   time-major flattened, lane-padded logits
      hT, cT     (L, B, H)   f32   final LSTM state
    """
    T, B, H, V = seq_len, batch, hidden, n_token

    def kernel(*refs):
        idx = 0
        tok_ref = refs[idx]; idx += 1
        fused_w0_ref = refs[idx]; idx += 1
        b0_ref = refs[idx]; idx += 1
        whh0_ref = refs[idx]; idx += 1
        upper = []
        for _ in range(n_layer - 1):
            upper.append((refs[idx], refs[idx + 1], refs[idx + 2]))
            idx += 3
        lin_w_ref = refs[idx]; lin_b_ref = refs[idx + 1]
        h0_ref = refs[idx + 2]; c0_ref = refs[idx + 3]
        logits_ref = refs[idx + 4]; hT_ref = refs[idx + 5]; cT_ref = refs[idx + 6]

        # ---- Embedding fused into layer-0 input projection: a single lane-dense
        #      one-hot matmul against the pre-fused (V, 4H) weight.
        tok = tok_ref[...]                                            # (T*B, 1)
        onehot = (tok == lax.broadcasted_iota(jnp.int32, (T * B, V), 1)
                  ).astype(jnp.float32)                               # (T*B, V)
        gx0 = jnp.dot(onehot, fused_w0_ref[...],
                      preferred_element_type=jnp.float32) + b0_ref[...]
        # Pre-split per-step gate inputs (hoisted off the serial recurrence).
        gx0_steps = [gx0[t * B:(t + 1) * B, :] for t in range(T)]

        whh0 = whh0_ref[...]                                          # (H, 4H)
        upper_w = [(w[...], u[...], b[...]) for (w, u, b) in upper]

        h = [h0_ref[l].astype(jnp.float32) for l in range(n_layer)]   # (B, H)
        c = [c0_ref[l].astype(jnp.float32) for l in range(n_layer)]   # (B, H)

        def cell(g, c_prev):
            # Full-vreg activations: one sigmoid + one tanh over (B, 4H),
            # then static lane slices (PyTorch gate order i, f, g, o).
            sig = jax.nn.sigmoid(g)
            th = jnp.tanh(g)
            i_g = sig[:, 0 * H:1 * H]
            f_g = sig[:, 1 * H:2 * H]
            g_g = th[:, 2 * H:3 * H]
            o_g = sig[:, 3 * H:4 * H]
            c_new = f_g * c_prev + i_g * g_g
            h_new = o_g * jnp.tanh(c_new)
            return h_new, c_new

        # ---- Wavefront-interleaved, fully unrolled recurrence (one basic block):
        #      layer0 step t, then layer1 step t, state carried in registers.
        ys = []
        for t in range(T):
            g = gx0_steps[t] + jnp.dot(h[0], whh0,
                                       preferred_element_type=jnp.float32)
            h[0], c[0] = cell(g, c[0])
            x_t = h[0]
            for li, (wih_l, whh_l, b_l) in enumerate(upper_w, start=1):
                g = (jnp.dot(x_t, wih_l, preferred_element_type=jnp.float32)
                     + b_l) + jnp.dot(h[li], whh_l,
                                      preferred_element_type=jnp.float32)
                h[li], c[li] = cell(g, c[li])
                x_t = h[li]
            ys.append(x_t)
            # TODO(synk): training-mode inter-layer dropout not implemented
            # (inference semantics; config dropout=0.0).

        # Final state written exactly once per layer.
        for l in range(n_layer):
            hT_ref[l] = h[l].astype(hT_ref.dtype)
            cT_ref[l] = c[l].astype(cT_ref.dtype)

        # ---- Output head: register-carried hidden sequence -> lane-padded
        #      (T*B, 128) logits block (unmasked full-tile store).
        y = jnp.concatenate(ys, axis=0)                               # (T*B, H)
        logits_ref[...] = (jnp.dot(y, lin_w_ref[...],
                                   preferred_element_type=jnp.float32)
                           + lin_b_ref[...]).astype(logits_ref.dtype)

    return kernel


# ---------------------------------------------------------------------------
# Init-time weight preparation (transposes, bias fuse, embedding fuse, padding)
# ---------------------------------------------------------------------------
def prepare_params(params):
    hp = jax.lax.Precision.HIGHEST
    fused_w0 = jnp.dot(params["emb"].astype(jnp.float32),
                       params["wih"][0].T.astype(jnp.float32),
                       precision=hp)                                  # (V, 4H)
    lin_w_pad = jnp.zeros((HIDDEN, VPAD), jnp.float32)
    lin_w_pad = lin_w_pad.at[:, :N_TOKEN].set(params["lin_w"].T)
    lin_b_pad = jnp.zeros((1, VPAD), jnp.float32)
    lin_b_pad = lin_b_pad.at[0, :N_TOKEN].set(params["lin_b"])
    prep = {
        "fused_w0": fused_w0,
        "b0": (params["b_ih"][0] + params["b_hh"][0]).reshape(1, 4 * HIDDEN),
        "whh0": params["whh"][0].T,
        "upper": [],
        "lin_w_pad": lin_w_pad,
        "lin_b_pad": lin_b_pad,
    }
    for l in range(1, N_LAYER):
        prep["upper"].append((
            params["wih"][l].T,                                       # (H, 4H)
            params["whh"][l].T,                                       # (H, 4H)
            (params["b_ih"][l] + params["b_hh"][l]).reshape(1, 4 * HIDDEN),
        ))
    return prep


# ---------------------------------------------------------------------------
# Full forward (Pallas version), jitted
# ---------------------------------------------------------------------------
def _forward_impl(prep, tokens, h0, c0):
    B, T = tokens.shape
    tok_tm = tokens.T.reshape(T * B, 1).astype(jnp.int32)             # time-major

    args = [tok_tm, prep["fused_w0"], prep["b0"], prep["whh0"]]
    for (wih_t, whh_t, b) in prep["upper"]:
        args += [wih_t, whh_t, b]
    args += [prep["lin_w_pad"], prep["lin_b_pad"], h0, c0]

    vmem = pl.BlockSpec(memory_space=pltpu.MemorySpace.VMEM)
    kernel = _make_fused_kernel(N_LAYER, T, B, HIDDEN, N_TOKEN, VPAD)
    logits_pad, hT, cT = pl.pallas_call(
        kernel,
        out_shape=(
            jax.ShapeDtypeStruct((T * B, VPAD), jnp.float32),
            jax.ShapeDtypeStruct((N_LAYER, B, HIDDEN), jnp.float32),
            jax.ShapeDtypeStruct((N_LAYER, B, HIDDEN), jnp.float32),
        ),
        in_specs=[vmem] * len(args),
        out_specs=(vmem, vmem, vmem),
    )(*args)

    logits = logits_pad[:, :N_TOKEN].reshape(T, B, N_TOKEN).transpose(1, 0, 2)
    return logits, (hT, cT)


_forward_jit = jax.jit(_forward_impl)


def cadenza_rnn_forward(prep, tokens, hidden=None):
    """tokens: int32 (B, T). Returns (logits (B,T,V), (h (L,B,H), c (L,B,H)))."""
    B = tokens.shape[0]
    if hidden is None:
        hidden = (jnp.zeros((N_LAYER, B, HIDDEN), jnp.float32),
                  jnp.zeros((N_LAYER, B, HIDDEN), jnp.float32))
    h0, c0 = hidden
    return _forward_jit(prep, tokens, h0, c0)


# ---------------------------------------------------------------------------
# Pure-JAX reference for validation
# ---------------------------------------------------------------------------
def ref_forward(params, tokens, hidden=None):
    B, T = tokens.shape
    x = params["emb"][tokens].astype(jnp.float32)        # (B, T, D)
    inp = jnp.transpose(x, (1, 0, 2))                    # (T, B, D)
    if hidden is None:
        h0s = jnp.zeros((N_LAYER, B, HIDDEN), jnp.float32)
        c0s = jnp.zeros((N_LAYER, B, HIDDEN), jnp.float32)
    else:
        h0s, c0s = hidden
    h_fin, c_fin = [], []
    for l in range(N_LAYER):
        wih = params["wih"][l]
        whh = params["whh"][l]
        b = params["b_ih"][l] + params["b_hh"][l]
        H = HIDDEN

        def step(carry, xt):
            h, c = carry
            gates = xt @ wih.T + h @ whh.T + b
            i = jax.nn.sigmoid(gates[:, :H])
            f = jax.nn.sigmoid(gates[:, H:2 * H])
            g = jnp.tanh(gates[:, 2 * H:3 * H])
            o = jax.nn.sigmoid(gates[:, 3 * H:])
            c2 = f * c + i * g
            h2 = o * jnp.tanh(c2)
            return (h2, c2), h2

        (hT, cT), ys = jax.lax.scan(step, (h0s[l], c0s[l]), inp)
        inp = ys
        h_fin.append(hT)
        c_fin.append(cT)
    y = jnp.transpose(inp, (1, 0, 2))
    logits = y @ params["lin_w"].T + params["lin_b"]
    return logits, (jnp.stack(h_fin), jnp.stack(c_fin))


# ---------------------------------------------------------------------------
# Deterministic parameter init (matches nn.Module shapes)
# ---------------------------------------------------------------------------
def init_params(key):
    k = 1.0 / jnp.sqrt(HIDDEN)
    keys = jax.random.split(key, 4 + 4 * N_LAYER)
    ki = iter(keys)
    params = {
        "emb": jax.random.normal(next(ki), (N_TOKEN, D_EMBED), jnp.float32),
        "wih": [], "whh": [], "b_ih": [], "b_hh": [],
    }
    for l in range(N_LAYER):
        din = D_EMBED if l == 0 else HIDDEN
        params["wih"].append(jax.random.uniform(
            next(ki), (4 * HIDDEN, din), jnp.float32, -k, k))
        params["whh"].append(jax.random.uniform(
            next(ki), (4 * HIDDEN, HIDDEN), jnp.float32, -k, k))
        params["b_ih"].append(jax.random.uniform(
            next(ki), (4 * HIDDEN,), jnp.float32, -k, k))
        params["b_hh"].append(jax.random.uniform(
            next(ki), (4 * HIDDEN,), jnp.float32, -k, k))
    params["lin_w"] = jax.random.uniform(
        next(ki), (N_TOKEN, HIDDEN), jnp.float32, -k, k)
    params["lin_b"] = jax.random.uniform(
        next(ki), (N_TOKEN,), jnp.float32, -k, k)
    return params


if __name__ == "__main__":
    key = jax.random.PRNGKey(0)
    pkey, tkey = jax.random.split(key)
    params = init_params(pkey)
    prep = prepare_params(params)                     # one-time, init-side prep
    tokens = jax.random.randint(tkey, (BATCH, SEQ), 0, N_TOKEN, jnp.int32)

    logits, (h_n, c_n) = cadenza_rnn_forward(prep, tokens)
    jax.block_until_ready((logits, h_n, c_n))

    # sanity check against a pure-JAX reference
    ref_logits, (ref_h, ref_c) = ref_forward(params, tokens)
    assert logits.shape == (BATCH, SEQ, N_TOKEN)
    assert h_n.shape == (N_LAYER, BATCH, HIDDEN)
    assert c_n.shape == (N_LAYER, BATCH, HIDDEN)
    assert jnp.allclose(logits, ref_logits, atol=1e-3, rtol=1e-3)
    assert jnp.allclose(h_n, ref_h, atol=1e-3, rtol=1e-3)
    assert jnp.allclose(c_n, ref_c, atol=1e-3, rtol=1e-3)

    print("KERNEL_OK")
</pallas_src>

<mosaic_0001>
module attributes {stable_mosaic.version = 11 : i64} {
  func.func @kernel(%arg0: memref<16x1xi32, #tpu.memory_space<vmem>>, %arg1: memref<32x128xf32, #tpu.memory_space<vmem>>, %arg2: memref<1x128xf32, #tpu.memory_space<vmem>>, %arg3: memref<32x128xf32, #tpu.memory_space<vmem>>, %arg4: memref<32x128xf32, #tpu.memory_space<vmem>>, %arg5: memref<32x128xf32, #tpu.memory_space<vmem>>, %arg6: memref<1x128xf32, #tpu.memory_space<vmem>>, %arg7: memref<32x128xf32, #tpu.memory_space<vmem>>, %arg8: memref<1x128xf32, #tpu.memory_space<vmem>>, %arg9: memref<2x2x32xf32, #tpu.memory_space<vmem>>, %arg10: memref<2x2x32xf32, #tpu.memory_space<vmem>>, %arg11: memref<16x128xf32, #tpu.memory_space<vmem>>, %arg12: memref<2x2x32xf32, #tpu.memory_space<vmem>>, %arg13: memref<2x2x32xf32, #tpu.memory_space<vmem>>) attributes {dimension_semantics = [], scalar_prefetch = 0 : i64, scratch_operands = 0 : i64, tpu.core_type = #tpu.core_type<tc>} {
    %c0 = arith.constant 0 : index
    %c0_0 = arith.constant 0 : index
    %0 = vector.load %arg0[%c0, %c0_0] : memref<16x1xi32, #tpu.memory_space<vmem>>, vector<16x1xi32>
    %1 = tpu.iota {dimensions = array<i32: 1>} : vector<16x32xi32>
    %2 = vector.broadcast %0 : vector<16x1xi32> to vector<16x32xi32>
    %3 = arith.cmpi eq, %2, %1 : vector<16x32xi32>
    %4 = arith.extui %3 : vector<16x32xi1> to vector<16x32xi32>
    %5 = arith.sitofp %4 : vector<16x32xi32> to vector<16x32xf32>
    %c0_1 = arith.constant 0 : index
    %c0_2 = arith.constant 0 : index
    %6 = vector.load %arg1[%c0_1, %c0_2] : memref<32x128xf32, #tpu.memory_space<vmem>>, vector<32x128xf32>
    %cst = arith.constant dense<0.000000e+00> : vector<16x128xf32>
    %7 = tpu.matmul %5, %6, %cst {dimension_numbers = #tpu.dot_dimension_numbers<[1], [0], [0], [1], [0, 0, 1, 1], [], []>} : vector<16x32xf32>, vector<32x128xf32>, vector<16x128xf32> -> vector<16x128xf32>
    %c0_3 = arith.constant 0 : index
    %c0_4 = arith.constant 0 : index
    %8 = vector.load %arg2[%c0_3, %c0_4] : memref<1x128xf32, #tpu.memory_space<vmem>>, vector<1x128xf32>
    %9 = vector.broadcast %8 : vector<1x128xf32> to vector<16x128xf32>
    %10 = arith.addf %7, %9 : vector<16x128xf32>
    %11 = vector.extract_strided_slice %10 {offsets = [0, 0], sizes = [2, 128], strides = [1, 1]} : vector<16x128xf32> to vector<2x128xf32>
    %12 = vector.extract_strided_slice %10 {offsets = [2, 0], sizes = [2, 128], strides = [1, 1]} : vector<16x128xf32> to vector<2x128xf32>
    %13 = vector.extract_strided_slice %10 {offsets = [4, 0], sizes = [2, 128], strides = [1, 1]} : vector<16x128xf32> to vector<2x128xf32>
    %14 = vector.extract_strided_slice %10 {offsets = [6, 0], sizes = [2, 128], strides = [1, 1]} : vector<16x128xf32> to vector<2x128xf32>
    %15 = vector.extract_strided_slice %10 {offsets = [8, 0], sizes = [2, 128], strides = [1, 1]} : vector<16x128xf32> to vector<2x128xf32>
    %16 = vector.extract_strided_slice %10 {offsets = [10, 0], sizes = [2, 128], strides = [1, 1]} : vector<16x128xf32> to vector<2x128xf32>
    %17 = vector.extract_strided_slice %10 {offsets = [12, 0], sizes = [2, 128], strides = [1, 1]} : vector<16x128xf32> to vector<2x128xf32>
    %18 = vector.extract_strided_slice %10 {offsets = [14, 0], sizes = [2, 128], strides = [1, 1]} : vector<16x128xf32> to vector<2x128xf32>
    %c0_5 = arith.constant 0 : index
    %c0_6 = arith.constant 0 : index
    %19 = vector.load %arg3[%c0_5, %c0_6] : memref<32x128xf32, #tpu.memory_space<vmem>>, vector<32x128xf32>
    %c0_7 = arith.constant 0 : index
    %c0_8 = arith.constant 0 : index
    %20 = vector.load %arg4[%c0_7, %c0_8] : memref<32x128xf32, #tpu.memory_space<vmem>>, vector<32x128xf32>
    %c0_9 = arith.constant 0 : index
    %c0_10 = arith.constant 0 : index
    %21 = vector.load %arg5[%c0_9, %c0_10] : memref<32x128xf32, #tpu.memory_space<vmem>>, vector<32x128xf32>
    %c0_11 = arith.constant 0 : index
    %c0_12 = arith.constant 0 : index
    %22 = vector.load %arg6[%c0_11, %c0_12] : memref<1x128xf32, #tpu.memory_space<vmem>>, vector<1x128xf32>
    %c0_13 = arith.constant 0 : index
    %c0_14 = arith.constant 0 : index
    %c0_15 = arith.constant 0 : index
    %23 = vector.load %arg9[%c0_13, %c0_14, %c0_15] : memref<2x2x32xf32, #tpu.memory_space<vmem>>, vector<1x2x32xf32>
    %24 = vector.shape_cast %23 : vector<1x2x32xf32> to vector<2x32xf32>
    %c1 = arith.constant 1 : index
    %c0_16 = arith.constant 0 : index
    %c0_17 = arith.constant 0 : index
    %25 = vector.load %arg9[%c1, %c0_16, %c0_17] : memref<2x2x32xf32, #tpu.memory_space<vmem>>, vector<1x2x32xf32>
    %26 = vector.shape_cast %25 : vector<1x2x32xf32> to vector<2x32xf32>
    %c0_18 = arith.constant 0 : index
    %c0_19 = arith.constant 0 : index
    %c0_20 = arith.constant 0 : index
    %27 = vector.load %arg10[%c0_18, %c0_19, %c0_20] : memref<2x2x32xf32, #tpu.memory_space<vmem>>, vector<1x2x32xf32>
    %28 = vector.shape_cast %27 : vector<1x2x32xf32> to vector<2x32xf32>
    %c1_21 = arith.constant 1 : index
    %c0_22 = arith.constant 0 : index
    %c0_23 = arith.constant 0 : index
    %29 = vector.load %arg10[%c1_21, %c0_22, %c0_23] : memref<2x2x32xf32, #tpu.memory_space<vmem>>, vector<1x2x32xf32>
    %30 = vector.shape_cast %29 : vector<1x2x32xf32> to vector<2x32xf32>
    %cst_24 = arith.constant dense<0.000000e+00> : vector<2x128xf32>
    %31 = tpu.matmul %24, %19, %cst_24 {dimension_numbers = #tpu.dot_dimension_numbers<[1], [0], [0], [1], [0, 0, 1, 1], [], []>} : vector<2x32xf32>, vector<32x128xf32>, vector<2x128xf32> -> vector<2x128xf32>
    %32 = arith.addf %11, %31 : vector<2x128xf32>
    %33 = arith.negf %32 : vector<2x128xf32>
    %34 = math.exp %33 : vector<2x128xf32>
    %cst_25 = arith.constant 1.000000e+00 : f32
    %35 = vector.broadcast %cst_25 : f32 to vector<2x128xf32>
    %36 = arith.addf %35, %34 : vector<2x128xf32>
    %37 = arith.divf %35, %36 : vector<2x128xf32>
    %38 = math.tanh %32 : vector<2x128xf32>
    %39 = vector.extract_strided_slice %37 {offsets = [0, 0], sizes = [2, 32], strides = [1, 1]} : vector<2x128xf32> to vector<2x32xf32>
    %40 = vector.extract_strided_slice %37 {offsets = [0, 32], sizes = [2, 32], strides = [1, 1]} : vector<2x128xf32> to vector<2x32xf32>
    %41 = vector.extract_strided_slice %38 {offsets = [0, 64], sizes = [2, 32], strides = [1, 1]} : vector<2x128xf32> to vector<2x32xf32>
    %42 = vector.extract_strided_slice %37 {offsets = [0, 96], sizes = [2, 32], strides = [1, 1]} : vector<2x128xf32> to vector<2x32xf32>
    %43 = arith.mulf %40, %28 : vector<2x32xf32>
    %44 = arith.mulf %39, %41 : vector<2x32xf32>
    %45 = arith.addf %43, %44 : vector<2x32xf32>
    %46 = math.tanh %45 : vector<2x32xf32>
    %47 = arith.mulf %42, %46 : vector<2x32xf32>
    %cst_26 = arith.constant dense<0.000000e+00> : vector<2x128xf32>
    %48 = tpu.matmul %47, %20, %cst_26 {dimension_numbers = #tpu.dot_dimension_numbers<[1], [0], [0], [1], [0, 0, 1, 1], [], []>} : vector<2x32xf32>, vector<32x128xf32>, vector<2x128xf32> -> vector<2x128xf32>
    %49 = vector.broadcast %22 : vector<1x128xf32> to vector<2x128xf32>
    %50 = arith.addf %48, %49 : vector<2x128xf32>
    %cst_27 = arith.constant dense<0.000000e+00> : vector<2x128xf32>
    %51 = tpu.matmul %26, %21, %cst_27 {dimension_numbers = #tpu.dot_dimension_numbers<[1], [0], [0], [1], [0, 0, 1, 1], [], []>} : vector<2x32xf32>, vector<32x128xf32>, vector<2x128xf32> -> vector<2x128xf32>
    %52 = arith.addf %50, %51 : vector<2x128xf32>
    %53 = arith.negf %52 : vector<2x128xf32>
    %54 = math.exp %53 : vector<2x128xf32>
    %cst_28 = arith.constant 1.000000e+00 : f32
    %55 = vector.broadcast %cst_28 : f32 to vector<2x128xf32>
    %56 = arith.addf %55, %54 : vector<2x128xf32>
    %57 = arith.divf %55, %56 : vector<2x128xf32>
    %58 = math.tanh %52 : vector<2x128xf32>
    %59 = vector.extract_strided_slice %57 {offsets = [0, 0], sizes = [2, 32], strides = [1, 1]} : vector<2x128xf32> to vector<2x32xf32>
    %60 = vector.extract_strided_slice %57 {offsets = [0, 32], sizes = [2, 32], strides = [1, 1]} : vector<2x128xf32> to vector<2x32xf32>
    %61 = vector.extract_strided_slice %58 {offsets = [0, 64], sizes = [2, 32], strides = [1, 1]} : vector<2x128xf32> to vector<2x32xf32>
    %62 = vector.extract_strided_slice %57 {offsets = [0, 96], sizes = [2, 32], strides = [1, 1]} : vector<2x128xf32> to vector<2x32xf32>
    %63 = arith.mulf %60, %30 : vector<2x32xf32>
    %64 = arith.mulf %59, %61 : vector<2x32xf32>
    %65 = arith.addf %63, %64 : vector<2x32xf32>
    %66 = math.tanh %65 : vector<2x32xf32>
    %67 = arith.mulf %62, %66 : vector<2x32xf32>
    %cst_29 = arith.constant dense<0.000000e+00> : vector<2x128xf32>
    %68 = tpu.matmul %47, %19, %cst_29 {dimension_numbers = #tpu.dot_dimension_numbers<[1], [0], [0], [1], [0, 0, 1, 1], [], []>} : vector<2x32xf32>, vector<32x128xf32>, vector<2x128xf32> -> vector<2x128xf32>
    %69 = arith.addf %12, %68 : vector<2x128xf32>
    %70 = arith.negf %69 : vector<2x128xf32>
    %71 = math.exp %70 : vector<2x128xf32>
    %cst_30 = arith.constant 1.000000e+00 : f32
    %72 = vector.broadcast %cst_30 : f32 to vector<2x128xf32>
    %73 = arith.addf %72, %71 : vector<2x128xf32>
    %74 = arith.divf %72, %73 : vector<2x128xf32>
    %75 = math.tanh %69 : vector<2x128xf32>
    %76 = vector.extract_strided_slice %74 {offsets = [0, 0], sizes = [2, 32], strides = [1, 1]} : vector<2x128xf32> to vector<2x32xf32>
    %77 = vector.extract_strided_slice %74 {offsets = [0, 32], sizes = [2, 32], strides = [1, 1]} : vector<2x128xf32> to vector<2x32xf32>
    %78 = vector.extract_strided_slice %75 {offsets = [0, 64], sizes = [2, 32], strides = [1, 1]} : vector<2x128xf32> to vector<2x32xf32>
    %79 = vector.extract_strided_slice %74 {offsets = [0, 96], sizes = [2, 32], strides = [1, 1]} : vector<2x128xf32> to vector<2x32xf32>
    %80 = arith.mulf %77, %45 : vector<2x32xf32>
    %81 = arith.mulf %76, %78 : vector<2x32xf32>
    %82 = arith.addf %80, %81 : vector<2x32xf32>
    %83 = math.tanh %82 : vector<2x32xf32>
    %84 = arith.mulf %79, %83 : vector<2x32xf32>
    %cst_31 = arith.constant dense<0.000000e+00> : vector<2x128xf32>
    %85 = tpu.matmul %84, %20, %cst_31 {dimension_numbers = #tpu.dot_dimension_numbers<[1], [0], [0], [1], [0, 0, 1, 1], [], []>} : vector<2x32xf32>, vector<32x128xf32>, vector<2x128xf32> -> vector<2x128xf32>
    %86 = vector.broadcast %22 : vector<1x128xf32> to vector<2x128xf32>
    %87 = arith.addf %85, %86 : vector<2x128xf32>
    %cst_32 = arith.constant dense<0.000000e+00> : vector<2x128xf32>
    %88 = tpu.matmul %67, %21, %cst_32 {dimension_numbers = #tpu.dot_dimension_numbers<[1], [0], [0], [1], [0, 0, 1, 1], [], []>} : vector<2x32xf32>, vector<32x128xf32>, vector<2x128xf32> -> vector<2x128xf32>
    %89 = arith.addf %87, %88 : vector<2x128xf32>
    %90 = arith.negf %89 : vector<2x128xf32>
    %91 = math.exp %90 : vector<2x128xf32>
    %cst_33 = arith.constant 1.000000e+00 : f32
    %92 = vector.broadcast %cst_33 : f32 to vector<2x128xf32>
    %93 = arith.addf %92, %91 : vector<2x128xf32>
    %94 = arith.divf %92, %93 : vector<2x128xf32>
    %95 = math.tanh %89 : vector<2x128xf32>
    %96 = vector.extract_strided_slice %94 {offsets = [0, 0], sizes = [2, 32], strides = [1, 1]} : vector<2x128xf32> to vector<2x32xf32>
    %97 = vector.extract_strided_slice %94 {offsets = [0, 32], sizes = [2, 32], strides = [1, 1]} : vector<2x128xf32> to vector<2x32xf32>
    %98 = vector.extract_strided_slice %95 {offsets = [0, 64], sizes = [2, 32], strides = [1, 1]} : vector<2x128xf32> to vector<2x32xf32>
    %99 = vector.extract_strided_slice %94 {offsets = [0, 96], sizes = [2, 32], strides = [1, 1]} : vector<2x128xf32> to vector<2x32xf32>
    %100 = arith.mulf %97, %65 : vector<2x32xf32>
    %101 = arith.mulf %96, %98 : vector<2x32xf32>
    %102 = arith.addf %100, %101 : vector<2x32xf32>
    %103 = math.tanh %102 : vector<2x32xf32>
    %104 = arith.mulf %99, %103 : vector<2x32xf32>
    %cst_34 = arith.constant dense<0.000000e+00> : vector<2x128xf32>
    %105 = tpu.matmul %84, %19, %cst_34 {dimension_numbers = #tpu.dot_dimension_numbers<[1], [0], [0], [1], [0, 0, 1, 1], [], []>} : vector<2x32xf32>, vector<32x128xf32>, vector<2x128xf32> -> vector<2x128xf32>
    %106 = arith.addf %13, %105 : vector<2x128xf32>
    %107 = arith.negf %106 : vector<2x128xf32>
    %108 = math.exp %107 : vector<2x128xf32>
    %cst_35 = arith.constant 1.000000e+00 : f32
    %109 = vector.broadcast %cst_35 : f32 to vector<2x128xf32>
    %110 = arith.addf %109, %108 : vector<2x128xf32>
    %111 = arith.divf %109, %110 : vector<2x128xf32>
    %112 = math.tanh %106 : vector<2x128xf32>
    %113 = vector.extract_strided_slice %111 {offsets = [0, 0], sizes = [2, 32], strides = [1, 1]} : vector<2x128xf32> to vector<2x32xf32>
    %114 = vector.extract_strided_slice %111 {offsets = [0, 32], sizes = [2, 32], strides = [1, 1]} : vector<2x128xf32> to vector<2x32xf32>
    %115 = vector.extract_strided_slice %112 {offsets = [0, 64], sizes = [2, 32], strides = [1, 1]} : vector<2x128xf32> to vector<2x32xf32>
    %116 = vector.extract_strided_slice %111 {offsets = [0, 96], sizes = [2, 32], strides = [1, 1]} : vector<2x128xf32> to vector<2x32xf32>
    %117 = arith.mulf %114, %82 : vector<2x32xf32>
    %118 = arith.mulf %113, %115 : vector<2x32xf32>
    %119 = arith.addf %117, %118 : vector<2x32xf32>
    %120 = math.tanh %119 : vector<2x32xf32>
    %121 = arith.mulf %116, %120 : vector<2x32xf32>
    %cst_36 = arith.constant dense<0.000000e+00> : vector<2x128xf32>
    %122 = tpu.matmul %121, %20, %cst_36 {dimension_numbers = #tpu.dot_dimension_numbers<[1], [0], [0], [1], [0, 0, 1, 1], [], []>} : vector<2x32xf32>, vector<32x128xf32>, vector<2x128xf32> -> vector<2x128xf32>
    %123 = vector.broadcast %22 : vector<1x128xf32> to vector<2x128xf32>
    %124 = arith.addf %122, %123 : vector<2x128xf32>
    %cst_37 = arith.constant dense<0.000000e+00> : vector<2x128xf32>
    %125 = tpu.matmul %104, %21, %cst_37 {dimension_numbers = #tpu.dot_dimension_numbers<[1], [0], [0], [1], [0, 0, 1, 1], [], []>} : vector<2x32xf32>, vector<32x128xf32>, vector<2x128xf32> -> vector<2x128xf32>
    %126 = arith.addf %124, %125 : vector<2x128xf32>
    %127 = arith.negf %126 : vector<2x128xf32>
    %128 = math.exp %127 : vector<2x128xf32>
    %cst_38 = arith.constant 1.000000e+00 : f32
    %129 = vector.broadcast %cst_38 : f32 to vector<2x128xf32>
    %130 = arith.addf %129, %128 : vector<2x128xf32>
    %131 = arith.divf %129, %130 : vector<2x128xf32>
    %132 = math.tanh %126 : vector<2x128xf32>
    %133 = vector.extract_strided_slice %131 {offsets = [0, 0], sizes = [2, 32], strides = [1, 1]} : vector<2x128xf32> to vector<2x32xf32>
    %134 = vector.extract_strided_slice %131 {offsets = [0, 32], sizes = [2, 32], strides = [1, 1]} : vector<2x128xf32> to vector<2x32xf32>
    %135 = vector.extract_strided_slice %132 {offsets = [0, 64], sizes = [2, 32], strides = [1, 1]} : vector<2x128xf32> to vector<2x32xf32>
    %136 = vector.extract_strided_slice %131 {offsets = [0, 96], sizes = [2, 32], strides = [1, 1]} : vector<2x128xf32> to vector<2x32xf32>
    %137 = arith.mulf %134, %102 : vector<2x32xf32>
    %138 = arith.mulf %133, %135 : vector<2x32xf32>
    %139 = arith.addf %137, %138 : vector<2x32xf32>
    %140 = math.tanh %139 : vector<2x32xf32>
    %141 = arith.mulf %136, %140 : vector<2x32xf32>
    %cst_39 = arith.constant dense<0.000000e+00> : vector<2x128xf32>
    %142 = tpu.matmul %121, %19, %cst_39 {dimension_numbers = #tpu.dot_dimension_numbers<[1], [0], [0], [1], [0, 0, 1, 1], [], []>} : vector<2x32xf32>, vector<32x128xf32>, vector<2x128xf32> -> vector<2x128xf32>
    %143 = arith.addf %14, %142 : vector<2x128xf32>
    %144 = arith.negf %143 : vector<2x128xf32>
    %145 = math.exp %144 : vector<2x128xf32>
    %cst_40 = arith.constant 1.000000e+00 : f32
    %146 = vector.broadcast %cst_40 : f32 to vector<2x128xf32>
    %147 = arith.addf %146, %145 : vector<2x128xf32>
    %148 = arith.divf %146, %147 : vector<2x128xf32>
    %149 = math.tanh %143 : vector<2x128xf32>
    %150 = vector.extract_strided_slice %148 {offsets = [0, 0], sizes = [2, 32], strides = [1, 1]} : vector<2x128xf32> to vector<2x32xf32>
    %151 = vector.extract_strided_slice %148 {offsets = [0, 32], sizes = [2, 32], strides = [1, 1]} : vector<2x128xf32> to vector<2x32xf32>
    %152 = vector.extract_strided_slice %149 {offsets = [0, 64], sizes = [2, 32], strides = [1, 1]} : vector<2x128xf32> to vector<2x32xf32>
    %153 = vector.extract_strided_slice %148 {offsets = [0, 96], sizes = [2, 32], strides = [1, 1]} : vector<2x128xf32> to vector<2x32xf32>
    %154 = arith.mulf %151, %119 : vector<2x32xf32>
    %155 = arith.mulf %150, %152 : vector<2x32xf32>
    %156 = arith.addf %154, %155 : vector<2x32xf32>
    %157 = math.tanh %156 : vector<2x32xf32>
    %158 = arith.mulf %153, %157 : vector<2x32xf32>
    %cst_41 = arith.constant dense<0.000000e+00> : vector<2x128xf32>
    %159 = tpu.matmul %158, %20, %cst_41 {dimension_numbers = #tpu.dot_dimension_numbers<[1], [0], [0], [1], [0, 0, 1, 1], [], []>} : vector<2x32xf32>, vector<32x128xf32>, vector<2x128xf32> -> vector<2x128xf32>
    %160 = vector.broadcast %22 : vector<1x128xf32> to vector<2x128xf32>
    %161 = arith.addf %159, %160 : vector<2x128xf32>
    %cst_42 = arith.constant dense<0.000000e+00> : vector<2x128xf32>
    %162 = tpu.matmul %141, %21, %cst_42 {dimension_numbers = #tpu.dot_dimension_numbers<[1], [0], [0], [1], [0, 0, 1, 1], [], []>} : vector<2x32xf32>, vector<32x128xf32>, vector<2x128xf32> -> vector<2x128xf32>
    %163 = arith.addf %161, %162 : vector<2x128xf32>
    %164 = arith.negf %163 : vector<2x128xf32>
    %165 = math.exp %164 : vector<2x128xf32>
    %cst_43 = arith.constant 1.000000e+00 : f32
    %166 = vector.broadcast %cst_43 : f32 to vector<2x128xf32>
    %167 = arith.addf %166, %165 : vector<2x128xf32>
    %168 = arith.divf %166, %167 : vector<2x128xf32>
    %169 = math.tanh %163 : vector<2x128xf32>
    %170 = vector.extract_strided_slice %168 {offsets = [0, 0], sizes = [2, 32], strides = [1, 1]} : vector<2x128xf32> to vector<2x32xf32>
    %171 = vector.extract_strided_slice %168 {offsets = [0, 32], sizes = [2, 32], strides = [1, 1]} : vector<2x128xf32> to vector<2x32xf32>
    %172 = vector.extract_strided_slice %169 {offsets = [0, 64], sizes = [2, 32], strides = [1, 1]} : vector<2x128xf32> to vector<2x32xf32>
    %173 = vector.extract_strided_slice %168 {offsets = [0, 96], sizes = [2, 32], strides = [1, 1]} : vector<2x128xf32> to vector<2x32xf32>
    %174 = arith.mulf %171, %139 : vector<2x32xf32>
    %175 = arith.mulf %170, %172 : vector<2x32xf32>
    %176 = arith.addf %174, %175 : vector<2x32xf32>
    %177 = math.tanh %176 : vector<2x32xf32>
    %178 = arith.mulf %173, %177 : vector<2x32xf32>
    %cst_44 = arith.constant dense<0.000000e+00> : vector<2x128xf32>
    %179 = tpu.matmul %158, %19, %cst_44 {dimension_numbers = #tpu.dot_dimension_numbers<[1], [0], [0], [1], [0, 0, 1, 1], [], []>} : vector<2x32xf32>, vector<32x128xf32>, vector<2x128xf32> -> vector<2x128xf32>
    %180 = arith.addf %15, %179 : vector<2x128xf32>
    %181 = arith.negf %180 : vector<2x128xf32>
    %182 = math.exp %181 : vector<2x128xf32>
    %cst_45 = arith.constant 1.000000e+00 : f32
    %183 = vector.broadcast %cst_45 : f32 to vector<2x128xf32>
    %184 = arith.addf %183, %182 : vector<2x128xf32>
    %185 = arith.divf %183, %184 : vector<2x128xf32>
    %186 = math.tanh %180 : vector<2x128xf32>
    %187 = vector.extract_strided_slice %185 {offsets = [0, 0], sizes = [2, 32], strides = [1, 1]} : vector<2x128xf32> to vector<2x32xf32>
    %188 = vector.extract_strided_slice %185 {offsets = [0, 32], sizes = [2, 32], strides = [1, 1]} : vector<2x128xf32> to vector<2x32xf32>
    %189 = vector.extract_strided_slice %186 {offsets = [0, 64], sizes = [2, 32], strides = [1, 1]} : vector<2x128xf32> to vector<2x32xf32>
    %190 = vector.extract_strided_slice %185 {offsets = [0, 96], sizes = [2, 32], strides = [1, 1]} : vector<2x128xf32> to vector<2x32xf32>
    %191 = arith.mulf %188, %156 : vector<2x32xf32>
    %192 = arith.mulf %187, %189 : vector<2x32xf32>
    %193 = arith.addf %191, %192 : vector<2x32xf32>
    %194 = math.tanh %193 : vector<2x32xf32>
    %195 = arith.mulf %190, %194 : vector<2x32xf32>
    %cst_46 = arith.constant dense<0.000000e+00> : vector<2x128xf32>
    %196 = tpu.matmul %195, %20, %cst_46 {dimension_numbers = #tpu.dot_dimension_numbers<[1], [0], [0], [1], [0, 0, 1, 1], [], []>} : vector<2x32xf32>, vector<32x128xf32>, vector<2x128xf32> -> vector<2x128xf32>
    %197 = vector.broadcast %22 : vector<1x128xf32> to vector<2x128xf32>
    %198 = arith.addf %196, %197 : vector<2x128xf32>
    %cst_47 = arith.constant dense<0.000000e+00> : vector<2x128xf32>
    %199 = tpu.matmul %178, %21, %cst_47 {dimension_numbers = #tpu.dot_dimension_numbers<[1], [0], [0], [1], [0, 0, 1, 1], [], []>} : vector<2x32xf32>, vector<32x128xf32>, vector<2x128xf32> -> vector<2x128xf32>
    %200 = arith.addf %198, %199 : vector<2x128xf32>
    %201 = arith.negf %200 : vector<2x128xf32>
    %202 = math.exp %201 : vector<2x128xf32>
    %cst_48 = arith.constant 1.000000e+00 : f32
    %203 = vector.broadcast %cst_48 : f32 to vector<2x128xf32>
    %204 = arith.addf %203, %202 : vector<2x128xf32>
    %205 = arith.divf %203, %204 : vector<2x128xf32>
    %206 = math.tanh %200 : vector<2x128xf32>
    %207 = vector.extract_strided_slice %205 {offsets = [0, 0], sizes = [2, 32], strides = [1, 1]} : vector<2x128xf32> to vector<2x32xf32>
    %208 = vector.extract_strided_slice %205 {offsets = [0, 32], sizes = [2, 32], strides = [1, 1]} : vector<2x128xf32> to vector<2x32xf32>
    %209 = vector.extract_strided_slice %206 {offsets = [0, 64], sizes = [2, 32], strides = [1, 1]} : vector<2x128xf32> to vector<2x32xf32>
    %210 = vector.extract_strided_slice %205 {offsets = [0, 96], sizes = [2, 32], strides = [1, 1]} : vector<2x128xf32> to vector<2x32xf32>
    %211 = arith.mulf %208, %176 : vector<2x32xf32>
    %212 = arith.mulf %207, %209 : vector<2x32xf32>
    %213 = arith.addf %211, %212 : vector<2x32xf32>
    %214 = math.tanh %213 : vector<2x32xf32>
    %215 = arith.mulf %210, %214 : vector<2x32xf32>
    %cst_49 = arith.constant dense<0.000000e+00> : vector<2x128xf32>
    %216 = tpu.matmul %195, %19, %cst_49 {dimension_numbers = #tpu.dot_dimension_numbers<[1], [0], [0], [1], [0, 0, 1, 1], [], []>} : vector<2x32xf32>, vector<32x128xf32>, vector<2x128xf32> -> vector<2x128xf32>
    %217 = arith.addf %16, %216 : vector<2x128xf32>
    %218 = arith.negf %217 : vector<2x128xf32>
    %219 = math.exp %218 : vector<2x128xf32>
    %cst_50 = arith.constant 1.000000e+00 : f32
    %220 = vector.broadcast %cst_50 : f32 to vector<2x128xf32>
    %221 = arith.addf %220, %219 : vector<2x128xf32>
    %222 = arith.divf %220, %221 : vector<2x128xf32>
    %223 = math.tanh %217 : vector<2x128xf32>
    %224 = vector.extract_strided_slice %222 {offsets = [0, 0], sizes = [2, 32], strides = [1, 1]} : vector<2x128xf32> to vector<2x32xf32>
    %225 = vector.extract_strided_slice %222 {offsets = [0, 32], sizes = [2, 32], strides = [1, 1]} : vector<2x128xf32> to vector<2x32xf32>
    %226 = vector.extract_strided_slice %223 {offsets = [0, 64], sizes = [2, 32], strides = [1, 1]} : vector<2x128xf32> to vector<2x32xf32>
    %227 = vector.extract_strided_slice %222 {offsets = [0, 96], sizes = [2, 32], strides = [1, 1]} : vector<2x128xf32> to vector<2x32xf32>
    %228 = arith.mulf %225, %193 : vector<2x32xf32>
    %229 = arith.mulf %224, %226 : vector<2x32xf32>
    %230 = arith.addf %228, %229 : vector<2x32xf32>
    %231 = math.tanh %230 : vector<2x32xf32>
    %232 = arith.mulf %227, %231 : vector<2x32xf32>
    %cst_51 = arith.constant dense<0.000000e+00> : vector<2x128xf32>
    %233 = tpu.matmul %232, %20, %cst_51 {dimension_numbers = #tpu.dot_dimension_numbers<[1], [0], [0], [1], [0, 0, 1, 1], [], []>} : vector<2x32xf32>, vector<32x128xf32>, vector<2x128xf32> -> vector<2x128xf32>
    %234 = vector.broadcast %22 : vector<1x128xf32> to vector<2x128xf32>
    %235 = arith.addf %233, %234 : vector<2x128xf32>
    %cst_52 = arith.constant dense<0.000000e+00> : vector<2x128xf32>
    %236 = tpu.matmul %215, %21, %cst_52 {dimension_numbers = #tpu.dot_dimension_numbers<[1], [0], [0], [1], [0, 0, 1, 1], [], []>} : vector<2x32xf32>, vector<32x128xf32>, vector<2x128xf32> -> vector<2x128xf32>
    %237 = arith.addf %235, %236 : vector<2x128xf32>
    %238 = arith.negf %237 : vector<2x128xf32>
    %239 = math.exp %238 : vector<2x128xf32>
    %cst_53 = arith.constant 1.000000e+00 : f32
    %240 = vector.broadcast %cst_53 : f32 to vector<2x128xf32>
    %241 = arith.addf %240, %239 : vector<2x128xf32>
    %242 = arith.divf %240, %241 : vector<2x128xf32>
    %243 = math.tanh %237 : vector<2x128xf32>
    %244 = vector.extract_strided_slice %242 {offsets = [0, 0], sizes = [2, 32], strides = [1, 1]} : vector<2x128xf32> to vector<2x32xf32>
    %245 = vector.extract_strided_slice %242 {offsets = [0, 32], sizes = [2, 32], strides = [1, 1]} : vector<2x128xf32> to vector<2x32xf32>
    %246 = vector.extract_strided_slice %243 {offsets = [0, 64], sizes = [2, 32], strides = [1, 1]} : vector<2x128xf32> to vector<2x32xf32>
    %247 = vector.extract_strided_slice %242 {offsets = [0, 96], sizes = [2, 32], strides = [1, 1]} : vector<2x128xf32> to vector<2x32xf32>
    %248 = arith.mulf %245, %213 : vector<2x32xf32>
    %249 = arith.mulf %244, %246 : vector<2x32xf32>
    %250 = arith.addf %248, %249 : vector<2x32xf32>
    %251 = math.tanh %250 : vector<2x32xf32>
    %252 = arith.mulf %247, %251 : vector<2x32xf32>
    %cst_54 = arith.constant dense<0.000000e+00> : vector<2x128xf32>
    %253 = tpu.matmul %232, %19, %cst_54 {dimension_numbers = #tpu.dot_dimension_numbers<[1], [0], [0], [1], [0, 0, 1, 1], [], []>} : vector<2x32xf32>, vector<32x128xf32>, vector<2x128xf32> -> vector<2x128xf32>
    %254 = arith.addf %17, %253 : vector<2x128xf32>
    %255 = arith.negf %254 : vector<2x128xf32>
    %256 = math.exp %255 : vector<2x128xf32>
    %cst_55 = arith.constant 1.000000e+00 : f32
    %257 = vector.broadcast %cst_55 : f32 to vector<2x128xf32>
    %258 = arith.addf %257, %256 : vector<2x128xf32>
    %259 = arith.divf %257, %258 : vector<2x128xf32>
    %260 = math.tanh %254 : vector<2x128xf32>
    %261 = vector.extract_strided_slice %259 {offsets = [0, 0], sizes = [2, 32], strides = [1, 1]} : vector<2x128xf32> to vector<2x32xf32>
    %262 = vector.extract_strided_slice %259 {offsets = [0, 32], sizes = [2, 32], strides = [1, 1]} : vector<2x128xf32> to vector<2x32xf32>
    %263 = vector.extract_strided_slice %260 {offsets = [0, 64], sizes = [2, 32], strides = [1, 1]} : vector<2x128xf32> to vector<2x32xf32>
    %264 = vector.extract_strided_slice %259 {offsets = [0, 96], sizes = [2, 32], strides = [1, 1]} : vector<2x128xf32> to vector<2x32xf32>
    %265 = arith.mulf %262, %230 : vector<2x32xf32>
    %266 = arith.mulf %261, %263 : vector<2x32xf32>
    %267 = arith.addf %265, %266 : vector<2x32xf32>
    %268 = math.tanh %267 : vector<2x32xf32>
    %269 = arith.mulf %264, %268 : vector<2x32xf32>
    %cst_56 = arith.constant dense<0.000000e+00> : vector<2x128xf32>
    %270 = tpu.matmul %269, %20, %cst_56 {dimension_numbers = #tpu.dot_dimension_numbers<[1], [0], [0], [1], [0, 0, 1, 1], [], []>} : vector<2x32xf32>, vector<32x128xf32>, vector<2x128xf32> -> vector<2x128xf32>
    %271 = vector.broadcast %22 : vector<1x128xf32> to vector<2x128xf32>
    %272 = arith.addf %270, %271 : vector<2x128xf32>
    %cst_57 = arith.constant dense<0.000000e+00> : vector<2x128xf32>
    %273 = tpu.matmul %252, %21, %cst_57 {dimension_numbers = #tpu.dot_dimension_numbers<[1], [0], [0], [1], [0, 0, 1, 1], [], []>} : vector<2x32xf32>, vector<32x128xf32>, vector<2x128xf32> -> vector<2x128xf32>
    %274 = arith.addf %272, %273 : vector<2x128xf32>
    %275 = arith.negf %274 : vector<2x128xf32>
    %276 = math.exp %275 : vector<2x128xf32>
    %cst_58 = arith.constant 1.000000e+00 : f32
    %277 = vector.broadcast %cst_58 : f32 to vector<2x128xf32>
    %278 = arith.addf %277, %276 : vector<2x128xf32>
    %279 = arith.divf %277, %278 : vector<2x128xf32>
    %280 = math.tanh %274 : vector<2x128xf32>
    %281 = vector.extract_strided_slice %279 {offsets = [0, 0], sizes = [2, 32], strides = [1, 1]} : vector<2x128xf32> to vector<2x32xf32>
    %282 = vector.extract_strided_slice %279 {offsets = [0, 32], sizes = [2, 32], strides = [1, 1]} : vector<2x128xf32> to vector<2x32xf32>
    %283 = vector.extract_strided_slice %280 {offsets = [0, 64], sizes = [2, 32], strides = [1, 1]} : vector<2x128xf32> to vector<2x32xf32>
    %284 = vector.extract_strided_slice %279 {offsets = [0, 96], sizes = [2, 32], strides = [1, 1]} : vector<2x128xf32> to vector<2x32xf32>
    %285 = arith.mulf %282, %250 : vector<2x32xf32>
    %286 = arith.mulf %281, %283 : vector<2x32xf32>
    %287 = arith.addf %285, %286 : vector<2x32xf32>
    %288 = math.tanh %287 : vector<2x32xf32>
    %289 = arith.mulf %284, %288 : vector<2x32xf32>
    %cst_59 = arith.constant dense<0.000000e+00> : vector<2x128xf32>
    %290 = tpu.matmul %269, %19, %cst_59 {dimension_numbers = #tpu.dot_dimension_numbers<[1], [0], [0], [1], [0, 0, 1, 1], [], []>} : vector<2x32xf32>, vector<32x128xf32>, vector<2x128xf32> -> vector<2x128xf32>
    %291 = arith.addf %18, %290 : vector<2x128xf32>
    %292 = arith.negf %291 : vector<2x128xf32>
    %293 = math.exp %292 : vector<2x128xf32>
    %cst_60 = arith.constant 1.000000e+00 : f32
    %294 = vector.broadcast %cst_60 : f32 to vector<2x128xf32>
    %295 = arith.addf %294, %293 : vector<2x128xf32>
    %296 = arith.divf %294, %295 : vector<2x128xf32>
    %297 = math.tanh %291 : vector<2x128xf32>
    %298 = vector.extract_strided_slice %296 {offsets = [0, 0], sizes = [2, 32], strides = [1, 1]} : vector<2x128xf32> to vector<2x32xf32>
    %299 = vector.extract_strided_slice %296 {offsets = [0, 32], sizes = [2, 32], strides = [1, 1]} : vector<2x128xf32> to vector<2x32xf32>
    %300 = vector.extract_strided_slice %297 {offsets = [0, 64], sizes = [2, 32], strides = [1, 1]} : vector<2x128xf32> to vector<2x32xf32>
    %301 = vector.extract_strided_slice %296 {offsets = [0, 96], sizes = [2, 32], strides = [1, 1]} : vector<2x128xf32> to vector<2x32xf32>
    %302 = arith.mulf %299, %267 : vector<2x32xf32>
    %303 = arith.mulf %298, %300 : vector<2x32xf32>
    %304 = arith.addf %302, %303 : vector<2x32xf32>
    %305 = math.tanh %304 : vector<2x32xf32>
    %306 = arith.mulf %301, %305 : vector<2x32xf32>
    %cst_61 = arith.constant dense<0.000000e+00> : vector<2x128xf32>
    %307 = tpu.matmul %306, %20, %cst_61 {dimension_numbers = #tpu.dot_dimension_numbers<[1], [0], [0], [1], [0, 0, 1, 1], [], []>} : vector<2x32xf32>, vector<32x128xf32>, vector<2x128xf32> -> vector<2x128xf32>
    %308 = vector.broadcast %22 : vector<1x128xf32> to vector<2x128xf32>
    %309 = arith.addf %307, %308 : vector<2x128xf32>
    %cst_62 = arith.constant dense<0.000000e+00> : vector<2x128xf32>
    %310 = tpu.matmul %289, %21, %cst_62 {dimension_numbers = #tpu.dot_dimension_numbers<[1], [0], [0], [1], [0, 0, 1, 1], [], []>} : vector<2x32xf32>, vector<32x128xf32>, vector<2x128xf32> -> vector<2x128xf32>
    %311 = arith.addf %309, %310 : vector<2x128xf32>
    %312 = arith.negf %311 : vector<2x128xf32>
    %313 = math.exp %312 : vector<2x128xf32>
    %cst_63 = arith.constant 1.000000e+00 : f32
    %314 = vector.broadcast %cst_63 : f32 to vector<2x128xf32>
    %315 = arith.addf %314, %313 : vector<2x128xf32>
    %316 = arith.divf %314, %315 : vector<2x128xf32>
    %317 = math.tanh %311 : vector<2x128xf32>
    %318 = vector.extract_strided_slice %316 {offsets = [0, 0], sizes = [2, 32], strides = [1, 1]} : vector<2x128xf32> to vector<2x32xf32>
    %319 = vector.extract_strided_slice %316 {offsets = [0, 32], sizes = [2, 32], strides = [1, 1]} : vector<2x128xf32> to vector<2x32xf32>
    %320 = vector.extract_strided_slice %317 {offsets = [0, 64], sizes = [2, 32], strides = [1, 1]} : vector<2x128xf32> to vector<2x32xf32>
    %321 = vector.extract_strided_slice %316 {offsets = [0, 96], sizes = [2, 32], strides = [1, 1]} : vector<2x128xf32> to vector<2x32xf32>
    %322 = arith.mulf %319, %287 : vector<2x32xf32>
    %323 = arith.mulf %318, %320 : vector<2x32xf32>
    %324 = arith.addf %322, %323 : vector<2x32xf32>
    %325 = math.tanh %324 : vector<2x32xf32>
    %326 = arith.mulf %321, %325 : vector<2x32xf32>
    %c0_64 = arith.constant 0 : index
    %c0_65 = arith.constant 0 : index
    %c0_66 = arith.constant 0 : index
    %327 = vector.load %arg12[%c0_64, %c0_65, %c0_66] : memref<2x2x32xf32, #tpu.memory_space<vmem>>, vector<1x2x32xf32>
    %328 = vector.shape_cast %327 : vector<1x2x32xf32> to vector<2x32xf32>
    %329 = vector.shape_cast %306 : vector<2x32xf32> to vector<1x2x32xf32>
    tpu.vector_store %arg12[%c0_64, %c0_65, %c0_66], %329 {strides = array<i32>} : memref<2x2x32xf32, #tpu.memory_space<vmem>>, vector<1x2x32xf32>,
    %c0_67 = arith.constant 0 : index
    %c0_68 = arith.constant 0 : index
    %c0_69 = arith.constant 0 : index
    %330 = vector.load %arg13[%c0_67, %c0_68, %c0_69] : memref<2x2x32xf32, #tpu.memory_space<vmem>>, vector<1x2x32xf32>
    %331 = vector.shape_cast %330 : vector<1x2x32xf32> to vector<2x32xf32>
    %332 = vector.shape_cast %304 : vector<2x32xf32> to vector<1x2x32xf32>
    tpu.vector_store %arg13[%c0_67, %c0_68, %c0_69], %332 {strides = array<i32>} : memref<2x2x32xf32, #tpu.memory_space<vmem>>, vector<1x2x32xf32>,
    %c1_70 = arith.constant 1 : index
    %c0_71 = arith.constant 0 : index
    %c0_72 = arith.constant 0 : index
    %333 = vector.load %arg12[%c1_70, %c0_71, %c0_72] : memref<2x2x32xf32, #tpu.memory_space<vmem>>, vector<1x2x32xf32>
    %334 = vector.shape_cast %333 : vector<1x2x32xf32> to vector<2x32xf32>
    %335 = vector.shape_cast %326 : vector<2x32xf32> to vector<1x2x32xf32>
    tpu.vector_store %arg12[%c1_70, %c0_71, %c0_72], %335 {strides = array<i32>} : memref<2x2x32xf32, #tpu.memory_space<vmem>>, vector<1x2x32xf32>,
    %c1_73 = arith.constant 1 : index
    %c0_74 = arith.constant 0 : index
    %c0_75 = arith.constant 0 : index
    %336 = vector.load %arg13[%c1_73, %c0_74, %c0_75] : memref<2x2x32xf32, #tpu.memory_space<vmem>>, vector<1x2x32xf32>
    %337 = vector.shape_cast %336 : vector<1x2x32xf32> to vector<2x32xf32>
    %338 = vector.shape_cast %324 : vector<2x32xf32> to vector<1x2x32xf32>
    tpu.vector_store %arg13[%c1_73, %c0_74, %c0_75], %338 {strides = array<i32>} : memref<2x2x32xf32, #tpu.memory_space<vmem>>, vector<1x2x32xf32>,
    %339 = tpu.concatenate %67, %104, %141, %178, %215, %252, %289, %326 in 0 : vector<2x32xf32>, vector<2x32xf32>, vector<2x32xf32>, vector<2x32xf32>, vector<2x32xf32>, vector<2x32xf32>, vector<2x32xf32>, vector<2x32xf32> -> vector<16x32xf32>
    %c0_76 = arith.constant 0 : index
    %c0_77 = arith.constant 0 : index
    %340 = vector.load %arg7[%c0_76, %c0_77] : memref<32x128xf32, #tpu.memory_space<vmem>>, vector<32x128xf32>
    %cst_78 = arith.constant dense<0.000000e+00> : vector<16x128xf32>
    %341 = tpu.matmul %339, %340, %cst_78 {dimension_numbers = #tpu.dot_dimension_numbers<[1], [0], [0], [1], [0, 0, 1, 1], [], []>} : vector<16x32xf32>, vector<32x128xf32>, vector<16x128xf32> -> vector<16x128xf32>
    %c0_79 = arith.constant 0 : index
    %c0_80 = arith.constant 0 : index
    %342 = vector.load %arg8[%c0_79, %c0_80] : memref<1x128xf32, #tpu.memory_space<vmem>>, vector<1x128xf32>
    %343 = vector.broadcast %342 : vector<1x128xf32> to vector<16x128xf32>
    %344 = arith.addf %341, %343 : vector<16x128xf32>
    %c0_81 = arith.constant 0 : index
    %c0_82 = arith.constant 0 : index
    %345 = vector.load %arg11[%c0_81, %c0_82] : memref<16x128xf32, #tpu.memory_space<vmem>>, vector<16x128xf32>
    tpu.vector_store %arg11[%c0_81, %c0_82], %344 {strides = array<i32>} : memref<16x128xf32, #tpu.memory_space<vmem>>, vector<16x128xf32>,
    return
  }
}

</mosaic_0001>

<bundles_post_ra>
// kernel: _forward_impl.1
= control target key start
LH: loop header
LB: loop body
LE: loop exit
PB: predicated region body
PF: predicated region fallthrough
CT: control target
= control target key end

     0   :  { %19 = vsyncpa [#allocation3], 0  ;;  %s2426_s0 = inlined_call_operand.vmem [shape: s32[16,1], index: 0, kind: input, shape index: {}]   ;;  %s2427_s1 = inlined_call_operand.vmem [shape: f32[32,128], index: 1, kind: input, shape index: {}]   ;;  %s2428_s2 = inlined_call_operand.vmem [shape: f32[1,128], index: 2, kind: input, shape index: {}]   ;;  %s2429_s3 = inlined_call_operand.hbm [shape: f32[32,128], index: 3, kind: input, shape index: {}]   ;;  %s2430_s4 = inlined_call_operand.hbm [shape: f32[32,128], index: 4, kind: input, shape index: {}]   ;;  %s2431_s5 = inlined_call_operand.hbm [shape: f32[32,128], index: 5, kind: input, shape index: {}]   ;;  %s2432_s6 = inlined_call_operand.vmem [shape: f32[1,128], index: 6, kind: input, shape index: {}]   ;;  %s2433_s7 = inlined_call_operand.hbm [shape: f32[32,128], index: 7, kind: input, shape index: {}]   ;;  %s2434_s8 = inlined_call_operand.hbm [shape: f32[1,128], index: 8, kind: input, shape index: {}]   ;;  %s2435_s9 = inlined_call_operand.vmem [shape: f32[2,2,32], index: 9, kind: input, shape index: {}]   ;;  %s2436_s10 = inlined_call_operand.vmem [shape: f32[2,2,32], index: 10, kind: input, shape index: {}]   ;;  %s2437_s11 = inlined_call_operand.vmem [shape: f32[16,128], index: 11, kind: output, shape index: {0}]   ;;  %s2438_s12 = inlined_call_operand.hbm [shape: f32[2,2,32], index: 12, kind: output, shape index: {1}]   ;;  %s2439_s13 = inlined_call_operand.hbm [shape: f32[2,2,32], index: 13, kind: output, shape index: {2}]  }
   0x1   :  { %20 = vsyncpa [#allocation6], 0 }
   0x2   :  { %21 = vsyncpa [#allocation9], 0 }
   0x3   :  { %22 = vsyncpa [#allocation4], 0 }
   0x4   :  { %23 = vsyncpa [#allocation13], 0  ;;  %s47_s27 = sshll.u32 %s2430_s4, 4  ;;  %s1922_s28 = smov [#allocation5]   ;;  %s48_s27 = int_to_ptr.hbm [resolvable:$true] %s47_s27 }
   0x5   :  { %s49_s29 = sshll.u32 %s1922_s28, 4  ;;  %s75_s15 = sshll.u32 %s2433_s7, 4  ;;  %s50_s29 = int_to_ptr.vmem [resolvable:$true] %s49_s29  ;;  %s76_s15 = int_to_ptr.hbm [resolvable:$true] %s75_s15 }
   0x6   :  { %s1923_s16 = smov 128   ;;  %s1924_s17 = smov 8  }
   0x7   :  { %55 = dma.hbm_to_vmem [thread:$0]  %s48_s27, 512, %s50_s29, [#allocation6], %s1923_s16, %s1923_s16, %s1924_s17  }
   0x8   :  { %s1925_s18 = smov [#allocation8]   ;;  %s34_s22 = sshll.u32 %s2429_s3, 4  ;;  %s35_s22 = int_to_ptr.hbm [resolvable:$true] %s34_s22 }
   0x9   :  { %s77_s19 = sshll.u32 %s1925_s18, 4  ;;  %s60_s24 = sshll.u32 %s2431_s5, 4  ;;  %s78_s19 = int_to_ptr.vmem [resolvable:$true] %s77_s19  ;;  %s61_s24 = int_to_ptr.hbm [resolvable:$true] %s60_s24 }
   0xa   :  { %83 = dma.hbm_to_vmem [thread:$0]  %s76_s15, 512, %s78_s19, [#allocation9], %s1923_s16, %s1923_s16, %s1924_s17  }
   0xb   :  { %s1926_s25 = smov [#allocation2]   ;;  %s1927_s7 = smov [#allocation7]  }
   0xc   :  { %s36_s26 = sshll.u32 %s1926_s25, 4  ;;  %s62_s27 = sshll.u32 %s1927_s7, 4  ;;  %s37_s26 = int_to_ptr.vmem [resolvable:$true] %s36_s26  ;;  %s63_s27 = int_to_ptr.vmem [resolvable:$true] %s62_s27 }
   0xd   :  { %42 = dma.hbm_to_vmem [thread:$0]  %s35_s22, 512, %s37_s26, [#allocation3], %s1923_s16, %s1923_s16, %s1924_s17  }
   0xe   :  { %s89_s30 = sshll.u32 %s2434_s8, 4  ;;  %s1928_s3 = smov [#allocation10]   ;;  %s90_s30 = int_to_ptr.hbm [resolvable:$true] %s89_s30 }
   0xf   :  { %68 = dma.hbm_to_vmem [thread:$0]  %s61_s24, 512, %s63_s27, [#allocation6], %s1923_s16, %s1923_s16, %s1924_s17  }
  0x10   :  { %s91_s14 = sshll.u32 %s1928_s3, 4  ;;  %s92_s14 = int_to_ptr.vmem [resolvable:$true] %s91_s14 }
  0x11   :  { %94 = dma.hbm_to_vmem [thread:$0]  %s90_s30, 16, %s92_s14, [#allocation9]  }
  0x12   :  { %1912 = dma.done.wait [#allocation3], 512  }
  0x13   :  { %1913 = vsyncadd [#allocation3], 4294966784 }
  0x14   :  { %1914 = dma.done.wait [#allocation6], 1024  }
  0x15   :  { %1915 = vsyncadd [#allocation6], 4294966272 }
  0x16   :  { %1916 = dma.done.wait [#allocation9], 528  }
  0x17   :  { %1917 = vsyncadd [#allocation9], 4294966768  ;;  %v1929_v0 = vmov 0   ;;  %v119_v1 = vld [vmem:[%s2426_s0] sm:$0xff]  ;;  %v138_v2 = vld [vmem:[%s2427_s1 + $0x18] sm:$0xff]  ;;  %vm143_vm0 = vcmask 261120   ;;  %v121_v12 = vlaneseq }
  0x18   :  { %1610 = vset.pattern.permute.xlu0 %v1929_v0  ;;  %1611 = vset.pattern.permute.xlu1 %v1929_v0  ;;  %v137_v3 = vld [vmem:[%s2427_s1 + $0x10] sm:$0xff]  ;;  %v2031_v4 = vld [vmem:[#allocation2 + $0x18] sm:$0xff]  ;;  %v136_v5 = vld [vmem:[%s2427_s1 + $0x8] sm:$0xff]  ;;  %v1931_v15 = vmov 0.0   ;;  %s1932_s27 = smov 64   ;;  %s1934_s16 = smov [#allocation11]  }
  0x19   :  { %124 = vperm.xlu0 %1610, %v119_v1   ;;  %162 = vmatpush.msra.mxu0 %v138_v2  ;;  %v2036_v6 = vld [vmem:[#allocation2 + $0x10] sm:$0xff]  ;;  %v135_v7 = vld [vmem:[%s2427_s1] sm:$0xff]  ;;  %v2043_v8 = vld [vmem:[#allocation2 + $0x8] sm:$0xff]  ;;  %s1930_s1 = smov 32   ;;  %v2065_v13 = vand.u32 127, %v121_v12  ;;  %s1510_s17 = sshll.u32 %s1934_s16, 4  ;;  %s1511_s17 = int_to_ptr.vmem [resolvable:$true] %s1510_s17 }
  0x1a   :  { %207 = vmatpush.msra.mxu1 %v2031_v4  ;;  %v2046_v9 = vld [vmem:[#allocation2] sm:$0xff]  ;;  %v2085_v43 = vld [vmem:[#allocation5 + $0x18] sm:$0xff]  ;;  %v2087_v44 = vld [vmem:[#allocation5 + $0x10] sm:$0xff]  ;;  %s1512_s20 = sshll.u32 %s2438_s12, 4  ;;  %s1935_s21 = smov [#allocation12]   ;;  %s1513_s20 = int_to_ptr.hbm [resolvable:$true] %s1512_s20 }
  0x1b   :  { %163 = vmatpush.msra.mxu0 %v137_v3  ;;  %v186_v10 = vld [vmem:[%s2435_s9] sm:$0x3]  ;;  %277 = vmatpush.msra.mxu3 %v2085_v43  ;;  %v2091_v45 = vld [vmem:[#allocation5 + $0x8] sm:$0xff]  ;;  %v2110_v49 = vld [vmem:[#allocation7 + $0x18] sm:$0xff]  ;;  %s1523_s22 = sshll.u32 %s1935_s21, 4  ;;  %s1525_s24 = sshll.u32 %s2439_s13, 4  ;;  %s1524_s22 = int_to_ptr.vmem [resolvable:$true] %s1523_s22  ;;  %s1526_s24 = int_to_ptr.hbm [resolvable:$true] %s1525_s24 }
  0x1c   :  { %208 = vmatpush.msra.mxu1 %v2036_v6  ;;  %v189_v11 = vld [vmem:[%s2436_s10] sm:$0x3]  ;;  %432 = vmatpush.msra.mxu2 %v2085_v43  ;;  %v2112_v50 = vld [vmem:[#allocation7 + $0x10] sm:$0xff]  ;;  %v2116_v51 = vld [vmem:[#allocation7 + $0x8] sm:$0xff]  ;;  %s1936_s25 = smov 2  }
  0x1d   :  { %164 = vmatpush.msra.mxu0 %v136_v5  ;;  %237 = vrot.lane.b32.xlu1 %v189_v11, %s1930_s1  ;;  %v2073_v17 = vld [vmem:[%s2428_s2] ss:$0 sm:$0xff]  ;;  %v1551_v54 = vld [vmem:[%s2435_s9 + $0x2] sm:$0x3] }
  0x1e   :  { %209 = vmatpush.msra.mxu1 %v2043_v8  ;;  %278 = vmatpush.msra.mxu3 %v2087_v44  ;;  %v2097_v46 = vld [vmem:[#allocation5] sm:$0xff] }
  0x1f   :  { %165 = vmatpush.msra.mxu0 %v135_v7  ;;  %433 = vmatpush.msra.mxu2 %v2087_v44  ;;  %v2120_v52 = vld [vmem:[#allocation7] sm:$0xff] }
  0x20   :  { %210 = vmatpush.msra.mxu1 %v2046_v9  ;;  %279 = vmatpush.msra.mxu3 %v2091_v45  ;;  %v2148_v59 = vld [vmem:[%s2432_s6] ss:$0 sm:$0xff]  ;;  %v1552_v0 = vld [vmem:[%s2436_s10 + $0x2] sm:$0x3] }
  0x21   :  { %515 = vmatpush.msrb.mxu0 %v2031_v4  ;;  %1553 = vmatmul.msk.f32.vlgmr.msra.gmra.mxu1 %vm143_vm0, %v186_v10 }
  0x22   :  { %362 = vmatpush.msrb.mxu1 %v2031_v4  ;;  %434 = vmatpush.msra.mxu2 %v2091_v45 }
  0x23   :  { %516 = vmatpush.msrb.mxu0 %v2036_v6  ;;  %280 = vmatpush.msra.mxu3 %v2097_v46 }
  0x24   :  { %363 = vmatpush.msrb.mxu1 %v2036_v6  ;;  %435 = vmatpush.msra.mxu2 %v2097_v46 }
  0x25   :  { %517 = vmatpush.msrb.mxu0 %v2043_v8  ;;  %300 = vmatpush.msrb.mxu3 %v2110_v49 }
  0x26   :  { %364 = vmatpush.msrb.mxu1 %v2043_v8  ;;  %610 = vmatpush.msrb.mxu2 %v2110_v49 }
  0x27   :  { %518 = vmatpush.msrb.mxu0 %v2046_v9  ;;  %301 = vmatpush.msrb.mxu3 %v2112_v50 }
  0x28   :  { %365 = vmatpush.msrb.mxu1 %v2046_v9  ;;  %611 = vmatpush.msrb.mxu2 %v2112_v50 }
  0x29   :  { %302 = vmatpush.msrb.mxu3 %v2116_v51 }
  0x2a   :  { %585 = vmatpush.msra.mxu1 %v2085_v43  ;;  %612 = vmatpush.msrb.mxu2 %v2116_v51 }
  0x2b   :  { %303 = vmatpush.msrb.mxu3 %v2120_v52 }
  0x2c   :  { %586 = vmatpush.msra.mxu1 %v2087_v44  ;;  %613 = vmatpush.msrb.mxu2 %v2120_v52 }
  0x2e   :  { %587 = vmatpush.msra.mxu1 %v2091_v45 }
  0x30   :  { %588 = vmatpush.msra.mxu1 %v2097_v46 }
  0x8b   :  { %v125_v14 = vpop.permute.xlu0 %124 }
  0x8c   :  { %vm129_vm1 = vcmp.eq.s32.totalorder %v125_v14, %v2065_v13 }
  0x8d   :  { %v1547_v16 = vsel %vm129_vm1, 1.0, %v1931_v15 }
  0x8e   :  { %1549 = vmatmul.msk.f32.vlgmr.msra.gmra.mxu0 %vm143_vm0, %v1547_v16 }
  0x8f   :  { %v238_v38 = vpop.permute.xlu1 %237  ;;  %738 = vmatpush.msra.mxu0 %v2085_v43 }
  0x91   :  { %739 = vmatpush.msra.mxu0 %v2087_v44 }
  0x93   :  { %740 = vmatpush.msra.mxu0 %v2091_v45 }
  0x95   :  { %741 = vmatpush.msra.mxu0 %v2097_v46 }
  0x9e   :  { %v212_v19 = vpop.f32.mrf.mxu1 }
 0x10b   :  { %v167_v18 = vpop.f32.mrf.mxu0 }
 0x10c   :  { %v2076_v20 = vadd.f32 %v2073_v17, %v167_v18 }
 0x10e   :  { %v215_v21 = vadd.f32 %v212_v19, %v2076_v20 }
 0x110   :  { %1615 = vtanh.f32 %v215_v21  ;;  %v1554_v23 = vmul.f32 -1.442695, %v215_v21 }
 0x112   :  { %1617 = vpow2.f32 %v1554_v23 }
 0x116   :  { %v1616_v22 = vpop.eup %1615 }
 0x117   :  { %242 = vrot.lane.b32.xlu0 %v1616_v22, %s1932_s27 }
 0x118   :  { %v1618_v24 = vpop.eup %1617 }
 0x119   :  { %v219_v25 = vadd.f32 1.0, %v1618_v24 }
 0x11b   :  { %1619 = vrcp.f32 %v219_v25  ;;  %v231_v31 = vand.u32 2147483648, %v219_v25  ;;  %vm225_vm3 = vweird.f32 %v219_v25  ;;  %v229_v32 = vand.u32 2147483647, %v219_v25 }
 0x11d   :  { %v232_v34 = vor.u32 1.1754944e-38, %v231_v31  ;;  %vm230_vm5 = vcmp.eq.f32.partialorder %v229_v32, 8.507059e+37 }
 0x121   :  { %v1620_v26 = vpop.eup %1619 }
 0x122   :  { %v221_v27 = vmul.f32 %v1620_v26, %v219_v25  ;;  %vm226_vm2 = vweird.f32 %v1620_v26 }
 0x123   :  { %vm227_vm4 = vmor %vm225_vm3, %vm226_vm2 }
 0x124   :  { %v222_v28 = vsub.f32 1.0, %v221_v27 }
 0x126   :  { %v223_v29 = vmul.f32 %v1620_v26, %v222_v28 }
 0x128   :  { %v224_v30 = vadd.f32 %v1620_v26, %v223_v29 }
 0x12a   :  { %v228_v33 = vsel %vm227_vm4, %v1620_v26, %v224_v30 }
 0x12b   :  { %v233_v35 = vsel %vm230_vm5, %v232_v34, %v228_v33 }
 0x12c   :  { %v240_v39 = vmul.f32 %v238_v38, %v233_v35 }
 0x189   :  { %v243_v36 = vpop.permute.xlu0 %242 }
 0x18a   :  { %v245_v37 = vmul.f32 %v243_v36, %v233_v35 }
 0x18c   :  { %247 = vrot.lane.b32.xlu1 %v245_v37, %s1930_s1 }
 0x1fe   :  { %v248_v40 = vpop.permute.xlu1 %247 }
 0x1ff   :  { %v2081_v41 = vadd.f32 %v248_v40, %v240_v39 }
 0x201   :  { %1621 = vtanh.f32 %v2081_v41  ;;  %v395_v40 = vrot.slane %v2081_v41, 6 }
 0x207   :  { %v1622_v42 = vpop.eup %1621 }
 0x208   :  { %253 = vrot.lane.b32.xlu2 %v1622_v42, %s1932_s27 }
 0x262   :  { %v254_v47 = vpop.permute.xlu2 %253 }
 0x263   :  { %v256_v48 = vmul.f32 %v254_v47, %v233_v35 }
 0x265   :  { %261 = vrot.lane.b32.xlu2 %v256_v48, %s1930_s1 }
 0x2bf   :  { %v262_v53 = vpop.permute.xlu2 %261 }
 0x2c0   :  { %1555 = vmatmul.msk.f32.vlgmr.msra.gmra.mxu3 %vm143_vm0, %v262_v53  ;;  %1558 = vmatmul.msk.f32.vlgmr.msrb.gmra.mxu1 %vm143_vm0, %v262_v53 }
 0x2c1   :  { %457 = vmatpush.msra.mxu3 %v2110_v49  ;;  %763 = vmatpush.msrb.mxu1 %v2110_v49 }
 0x2c3   :  { %458 = vmatpush.msra.mxu3 %v2112_v50  ;;  %764 = vmatpush.msrb.mxu1 %v2112_v50 }
 0x2c5   :  { %459 = vmatpush.msra.mxu3 %v2116_v51  ;;  %765 = vmatpush.msrb.mxu1 %v2116_v51 }
 0x2c7   :  { %460 = vmatpush.msra.mxu3 %v2120_v52  ;;  %766 = vmatpush.msrb.mxu1 %v2120_v52 }
 0x2c8   :  { %1556 = vmatmul.msk.f32.vlgmr.msrb.gmra.mxu3 %vm143_vm0, %v1551_v54  ;;  %v120_v54 = vld [vmem:[%s2426_s0 + $0x8] sm:$0xff] }
 0x2c9   :  { %668 = vmatpush.msrb.mxu3 %v2031_v4 }
 0x2cb   :  { %669 = vmatpush.msrb.mxu3 %v2036_v6 }
 0x2cd   :  { %670 = vmatpush.msrb.mxu3 %v2043_v8 }
 0x2cf   :  { %671 = vmatpush.msrb.mxu3 %v2046_v9 }
 0x33d   :  { %v367_v55 = vpop.f32.mrf.mxu1 }
 0x33e   :  { %v371_v56 = vrot.slane %v367_v55, 6 }
 0x340   :  { %v373_v57 = vadd.f32 %v371_v56, %v2076_v20 }
 0x342   :  { %1623 = vtanh.f32 %v373_v57  ;;  %v1559_v2 = vmul.f32 -1.442695, %v373_v57 }
 0x343   :  { %v282_v58 = vpop.f32.mrf.mxu3 }
 0x344   :  { %v283_v61 = vadd.f32 %v2148_v59, %v282_v58 }
 0x348   :  { %v1624_v60 = vpop.eup %1623 }
 0x349   :  { %399 = vrot.lane.b32.xlu0 %v1624_v60, %s1932_s27 }
 0x34b   :  { %v305_v62 = vpop.f32.mrf.mxu3 }
 0x34c   :  { %v308_v63 = vadd.f32 %v305_v62, %v283_v61 }
 0x34e   :  { %1625 = vtanh.f32 %v308_v63  ;;  %v1557_v5 = vmul.f32 -1.442695, %v308_v63 }
 0x34f   :  { %1627 = vpow2.f32 %v1559_v2 }
 0x350   :  { %1629 = vpow2.f32 %v1557_v5 }
 0x351   :  { %330 = vrot.lane.b32.xlu0 %v1552_v0, %s1930_s1 }
 0x354   :  { %v1626_v1 = vpop.eup %1625 }
 0x355   :  { %335 = vrot.lane.b32.xlu1 %v1626_v1, %s1932_s27  ;;  %v1628_v3 = vpop.eup %1627 }
 0x356   :  { %v377_v7 = vadd.f32 1.0, %v1628_v3  ;;  %v1630_v10 = vpop.eup %1629 }
 0x357   :  { %v312_v12 = vadd.f32 1.0, %v1630_v10 }
 0x358   :  { %1631 = vrcp.f32 %v377_v7  ;;  %v389_v23 = vand.u32 2147483648, %v377_v7  ;;  %vm383_vm7 = vweird.f32 %v377_v7  ;;  %v387_v24 = vand.u32 2147483647, %v377_v7 }
 0x359   :  { %1633 = vrcp.f32 %v312_v12  ;;  %v324_v33 = vand.u32 2147483648, %v312_v12  ;;  %vm318_vm11 = vweird.f32 %v312_v12  ;;  %v322_v34 = vand.u32 2147483647, %v312_v12 }
 0x35a   :  { %v390_v27 = vor.u32 1.1754944e-38, %v389_v23  ;;  %vm388_vm9 = vcmp.eq.f32.partialorder %v387_v24, 8.507059e+37 }
 0x35b   :  { %v325_v36 = vor.u32 1.1754944e-38, %v324_v33  ;;  %vm323_vm13 = vcmp.eq.f32.partialorder %v322_v34, 8.507059e+37 }
 0x35e   :  { %v1632_v11 = vpop.eup %1631 }
 0x35f   :  { %v379_v14 = vmul.f32 %v1632_v11, %v377_v7  ;;  %v1634_v19 = vpop.eup %1633  ;;  %vm384_vm6 = vweird.f32 %v1632_v11 }
 0x360   :  { %v314_v22 = vmul.f32 %v1634_v19, %v312_v12  ;;  %vm385_vm8 = vmor %vm383_vm7, %vm384_vm6  ;;  %vm319_vm10 = vweird.f32 %v1634_v19 }
 0x361   :  { %v380_v16 = vsub.f32 1.0, %v379_v14  ;;  %vm320_vm12 = vmor %vm318_vm11, %vm319_vm10 }
 0x362   :  { %v315_v26 = vsub.f32 1.0, %v314_v22 }
 0x363   :  { %v381_v18 = vmul.f32 %v1632_v11, %v380_v16 }
 0x364   :  { %v316_v31 = vmul.f32 %v1634_v19, %v315_v26 }
 0x365   :  { %v382_v21 = vadd.f32 %v1632_v11, %v381_v18 }
 0x366   :  { %v317_v32 = vadd.f32 %v1634_v19, %v316_v31 }
 0x367   :  { %v386_v25 = vsel %vm385_vm8, %v1632_v11, %v382_v21 }
 0x368   :  { %v391_v29 = vsel %vm388_vm9, %v390_v27, %v386_v25  ;;  %v321_v35 = vsel %vm320_vm12, %v1634_v19, %v317_v32 }
 0x369   :  { %v326_v37 = vsel %vm323_vm13, %v325_v36, %v321_v35  ;;  %v397_v42 = vmul.f32 %v395_v40, %v391_v29 }
 0x3bb   :  { %v400_v28 = vpop.permute.xlu0 %399 }
 0x3bc   :  { %v402_v30 = vmul.f32 %v400_v28, %v391_v29 }
 0x3be   :  { %404 = vrot.lane.b32.xlu2 %v402_v30, %s1930_s1 }
 0x3c3   :  { %v331_v55 = vpop.permute.xlu0 %330 }
 0x3c4   :  { %v333_v56 = vmul.f32 %v331_v55, %v326_v37 }
 0x3c7   :  { %v336_v38 = vpop.permute.xlu1 %335 }
 0x3c8   :  { %v338_v39 = vmul.f32 %v336_v38, %v326_v37 }
 0x3ca   :  { %340 = vrot.lane.b32.xlu1 %v338_v39, %s1930_s1 }
 0x3d2   :  { %127 = vperm.xlu1 %1611, %v120_v54  }
 0x418   :  { %v405_v47 = vpop.permute.xlu2 %404 }
 0x419   :  { %v2160_v48 = vadd.f32 %v405_v47, %v397_v42 }
 0x41b   :  { %1635 = vtanh.f32 %v2160_v48 }
 0x421   :  { %v1636_v53 = vpop.eup %1635 }
 0x422   :  { %410 = vrot.lane.b32.xlu2 %v1636_v53, %s1932_s27 }
 0x43c   :  { %v341_v57 = vpop.permute.xlu1 %340 }
 0x43d   :  { %v2167_v58 = vadd.f32 %v341_v57, %v333_v56 }
 0x43f   :  { %1637 = vtanh.f32 %v2167_v58 }
 0x444   :  { %v128_v63 = vpop.permute.xlu1 %127 }
 0x445   :  { %v1638_v41 = vpop.eup %1637  ;;  %vm130_vm14 = vcmp.eq.s32.totalorder %v128_v63, %v2065_v13 }
 0x446   :  { %346 = vrot.lane.b32.xlu0 %v1638_v41, %s1932_s27  ;;  %v1548_v0 = vsel %vm130_vm14, 1.0, %v1931_v15 }
 0x447   :  { %1550 = vmatmul.msk.f32.gmra.mxu0 %vm143_vm0, %v1548_v0 }
 0x47c   :  { %v411_v60 = vpop.permute.xlu2 %410 }
 0x47d   :  { %v413_v61 = vmul.f32 %v411_v60, %v391_v29 }
 0x47f   :  { %v415_v62 = vrot.slane %v413_v61, 2 }
 0x481   :  { %416 = vrot.lane.b32.xlu2 %v415_v62, %s1930_s1  ;;  %v548_v62 = vrot.slane %v2160_v48, 6 }
 0x4b8   :  { %v347_v1 = vpop.permute.xlu0 %346 }
 0x4b9   :  { %v2175_v2 = vmul.f32 %v347_v1, %v326_v37 }
 0x4bb   :  { %441 = vrot.lane.b32.xlu0 %v2175_v2, %s1930_s1 }
 0x4c4   :  { %v2194_v15 = vpop.f32.mrf.mxu0 }
 0x4db   :  { %v417_v3 = vpop.permute.xlu2 %416 }
 0x4dc   :  { %1560 = vmatmul.msk.f32.vlgmr.msra.gmra.mxu2 %vm143_vm0, %v417_v3  ;;  %1563 = vmatmul.msk.f32.vlgmr.msrb.gmra.mxu0 %vm143_vm0, %v417_v3 }
 0x4dd   :  { %821 = vmatpush.msra.mxu2 %v2031_v4  ;;  %912 = vmatpush.msrb.mxu0 %v2110_v49 }
 0x4df   :  { %822 = vmatpush.msra.mxu2 %v2036_v6  ;;  %913 = vmatpush.msrb.mxu0 %v2112_v50 }
 0x4e1   :  { %823 = vmatpush.msra.mxu2 %v2043_v8  ;;  %914 = vmatpush.msrb.mxu0 %v2116_v51 }
 0x4e3   :  { %824 = vmatpush.msra.mxu2 %v2046_v9  ;;  %915 = vmatpush.msrb.mxu0 %v2120_v52 }
 0x52d   :  { %v442_v13 = vpop.permute.xlu0 %441 }
 0x52e   :  { %1561 = vmatmul.msk.f32.vlgmr.msra.gmra.mxu3 %vm143_vm0, %v442_v13 }
 0x52f   :  { %887 = vmatpush.msra.mxu3 %v2085_v43 }
 0x531   :  { %888 = vmatpush.msra.mxu3 %v2087_v44 }
 0x533   :  { %889 = vmatpush.msra.mxu3 %v2091_v45 }
 0x535   :  { %890 = vmatpush.msra.mxu3 %v2097_v46 }
 0x559   :  { %v520_v5 = vpop.f32.mrf.mxu0 }
 0x55a   :  { %v524_v7 = vrot.slane %v520_v5, 4 }
 0x55c   :  { %v526_v10 = vadd.f32 %v524_v7, %v2076_v20 }
 0x55e   :  { %1639 = vtanh.f32 %v526_v10  ;;  %v1564_v12 = vmul.f32 -1.442695, %v526_v10 }
 0x55f   :  { %v437_v14 = vpop.f32.mrf.mxu2 }
 0x560   :  { %1641 = vpow2.f32 %v1564_v12  ;;  %v438_v16 = vadd.f32 %v2148_v59, %v437_v14 }
 0x564   :  { %v1640_v11 = vpop.eup %1639 }
 0x565   :  { %552 = vrot.lane.b32.xlu1 %v1640_v11, %s1932_s27 }
 0x566   :  { %v1642_v21 = vpop.eup %1641 }
 0x567   :  { %v530_v22 = vadd.f32 1.0, %v1642_v21 }
 0x569   :  { %v542_v29 = vand.u32 2147483648, %v530_v22  ;;  %vm536_vm1 = vweird.f32 %v530_v22  ;;  %v540_v30 = vand.u32 2147483647, %v530_v22 }
 0x56b   :  { %v543_v32 = vor.u32 1.1754944e-38, %v542_v29  ;;  %vm541_vm3 = vcmp.eq.f32.partialorder %v540_v30, 8.507059e+37 }
 0x5b1   :  { %v462_v18 = vpop.f32.mrf.mxu3 }
 0x5b2   :  { %v465_v19 = vadd.f32 %v462_v18, %v438_v16 }
 0x5b4   :  { %1643 = vtanh.f32 %v465_v19  ;;  %v1562_v36 = vmul.f32 -1.442695, %v465_v19 }
 0x5b5   :  { %1645 = vrcp.f32 %v530_v22 }
 0x5b6   :  { %1647 = vpow2.f32 %v1562_v36 }
 0x5ba   :  { %v1644_v23 = vpop.eup %1643 }
 0x5bb   :  { %488 = vrot.lane.b32.xlu2 %v1644_v23, %s1932_s27  ;;  %v1646_v24 = vpop.eup %1645 }
 0x5bc   :  { %v532_v25 = vmul.f32 %v1646_v24, %v530_v22  ;;  %vm537_vm15 = vweird.f32 %v1646_v24  ;;  %v1648_v37 = vpop.eup %1647 }
 0x5bd   :  { %vm538_vm2 = vmor %vm536_vm1, %vm537_vm15  ;;  %v469_v38 = vadd.f32 1.0, %v1648_v37  ;;  %vm1452_vm1 = vcmask 1041408  }
 0x5be   :  { %v533_v26 = vsub.f32 1.0, %v532_v25 }
 0x5bf   :  { %1649 = vrcp.f32 %v469_v38  ;;  %v481_v54 = vand.u32 2147483648, %v469_v38  ;;  %vm475_vm5 = vweird.f32 %v469_v38  ;;  %v479_v55 = vand.u32 2147483647, %v469_v38 }
 0x5c0   :  { %v534_v27 = vmul.f32 %v1646_v24, %v533_v26 }
 0x5c1   :  { %v482_v57 = vor.u32 1.1754944e-38, %v481_v54  ;;  %vm480_vm7 = vcmp.eq.f32.partialorder %v479_v55, 8.507059e+37 }
 0x5c2   :  { %v535_v28 = vadd.f32 %v1646_v24, %v534_v27 }
 0x5c4   :  { %v539_v31 = vsel %vm538_vm2, %v1646_v24, %v535_v28  ;;  %vm1454_vm2 = vcmask 1043456  }
 0x5c5   :  { %v544_v34 = vsel %vm541_vm3, %v543_v32, %v539_v31  ;;  %v1650_v39 = vpop.eup %1649 }
 0x5c6   :  { %v471_v40 = vmul.f32 %v1650_v39, %v469_v38  ;;  %vm476_vm4 = vweird.f32 %v1650_v39  ;;  %v550_v63 = vmul.f32 %v548_v62, %v544_v34 }
 0x5c7   :  { %vm477_vm6 = vmor %vm475_vm5, %vm476_vm4 }
 0x5c8   :  { %v472_v42 = vsub.f32 1.0, %v471_v40 }
 0x5ca   :  { %v473_v47 = vmul.f32 %v1650_v39, %v472_v42 }
 0x5cc   :  { %v474_v53 = vadd.f32 %v1650_v39, %v473_v47 }
 0x5ce   :  { %v478_v56 = vsel %vm477_vm6, %v1650_v39, %v474_v53 }
 0x5cf   :  { %v483_v60 = vsel %vm480_vm7, %v482_v57, %v478_v56 }
 0x5d0   :  { %v486_v13 = vmul.f32 %v483_v60, %v2167_v58 }
 0x5d7   :  { %v553_v33 = vpop.permute.xlu1 %552 }
 0x5d8   :  { %v555_v35 = vmul.f32 %v553_v33, %v544_v34 }
 0x5da   :  { %557 = vrot.lane.b32.xlu0 %v555_v35, %s1930_s1 }
 0x615   :  { %v489_v41 = vpop.permute.xlu2 %488 }
 0x616   :  { %v491_v61 = vmul.f32 %v489_v41, %v483_v60 }
 0x618   :  { %493 = vrot.lane.b32.xlu1 %v491_v61, %s1930_s1 }
 0x64c   :  { %v558_v0 = vpop.permute.xlu0 %557 }
 0x64d   :  { %v2203_v1 = vadd.f32 %v558_v0, %v550_v63 }
 0x64f   :  { %1651 = vtanh.f32 %v2203_v1 }
 0x655   :  { %v1652_v3 = vpop.eup %1651 }
 0x656   :  { %563 = vrot.lane.b32.xlu2 %v1652_v3, %s1932_s27 }
 0x68a   :  { %v494_v5 = vpop.permute.xlu1 %493 }
 0x68b   :  { %v2208_v7 = vadd.f32 %v494_v5, %v486_v13 }
 0x68d   :  { %1653 = vtanh.f32 %v2208_v7 }
 0x693   :  { %v1654_v10 = vpop.eup %1653 }
 0x694   :  { %499 = vrot.lane.b32.xlu0 %v1654_v10, %s1932_s27 }
 0x6b0   :  { %v564_v48 = vpop.permute.xlu2 %563 }
 0x6b1   :  { %v566_v11 = vmul.f32 %v564_v48, %v544_v34  ;;  %v701_v48 = vrot.slane %v2203_v1, 6 }
 0x6b3   :  { %v568_v12 = vrot.slane %v566_v11, 4 }
 0x6b5   :  { %569 = vrot.lane.b32.xlu1 %v568_v12, %s1930_s1 }
 0x706   :  { %v500_v14 = vpop.permute.xlu0 %499 }
 0x707   :  { %v2213_v16 = vmul.f32 %v500_v14, %v483_v60 }
 0x709   :  { %594 = vrot.lane.b32.xlu2 %v2213_v16, %s1930_s1 }
 0x727   :  { %v570_v58 = vpop.permute.xlu1 %569 }
 0x728   :  { %1565 = vmatmul.msk.f32.vlgmr.msra.gmra.mxu1 %vm143_vm0, %v570_v58  ;;  %1568 = vmatmul.msk.f32.vlgmr.msrb.gmra.mxu3 %vm143_vm0, %v570_v58 }
 0x729   :  { %970 = vmatpush.msra.mxu1 %v2031_v4  ;;  %1065 = vmatpush.msrb.mxu3 %v2110_v49 }
 0x72b   :  { %971 = vmatpush.msra.mxu1 %v2036_v6  ;;  %1066 = vmatpush.msrb.mxu3 %v2112_v50 }
 0x72d   :  { %972 = vmatpush.msra.mxu1 %v2043_v8  ;;  %1067 = vmatpush.msrb.mxu3 %v2116_v51 }
 0x72f   :  { %973 = vmatpush.msra.mxu1 %v2046_v9  ;;  %1068 = vmatpush.msrb.mxu3 %v2120_v52 }
 0x763   :  { %v595_v18 = vpop.permute.xlu2 %594 }
 0x764   :  { %1566 = vmatmul.msk.f32.vlgmr.msrb.gmra.mxu2 %vm143_vm0, %v595_v18 }
 0x765   :  { %1040 = vmatpush.msrb.mxu2 %v2085_v43 }
 0x767   :  { %1041 = vmatpush.msrb.mxu2 %v2087_v44 }
 0x769   :  { %1042 = vmatpush.msrb.mxu2 %v2091_v45 }
 0x76b   :  { %1043 = vmatpush.msrb.mxu2 %v2097_v46 }
 0x7a5   :  { %v590_v24 = vpop.f32.mrf.mxu1 }
 0x7a6   :  { %v591_v25 = vadd.f32 %v2148_v59, %v590_v24 }
 0x7ab   :  { %v673_v19 = vpop.f32.mrf.mxu3 }
 0x7ac   :  { %v677_v21 = vrot.slane %v673_v19, 2 }
 0x7ae   :  { %v679_v22 = vadd.f32 %v677_v21, %v2076_v20 }
 0x7b0   :  { %1655 = vtanh.f32 %v679_v22  ;;  %v1569_v29 = vmul.f32 -1.442695, %v679_v22 }
 0x7b6   :  { %v1656_v23 = vpop.eup %1655 }
 0x7b7   :  { %705 = vrot.lane.b32.xlu0 %v1656_v23, %s1932_s27 }
 0x7e7   :  { %v615_v26 = vpop.f32.mrf.mxu2 }
 0x7e8   :  { %v618_v27 = vadd.f32 %v615_v26, %v591_v25  ;;  %v1440_v25 = vrot.slane %v2213_v16, 6  ;;  %v2273_v16 = vadd.f32 %v2073_v17, %v2194_v15 }
 0x7ea   :  { %1657 = vtanh.f32 %v618_v27  ;;  %v1567_v53 = vmul.f32 -1.442695, %v618_v27 }
 0x7eb   :  { %1659 = vpow2.f32 %v1569_v29 }
 0x7f0   :  { %v1658_v28 = vpop.eup %1657 }
 0x7f1   :  { %641 = vrot.lane.b32.xlu1 %v1658_v28, %s1932_s27  ;;  %v1660_v30 = vpop.eup %1659  ;;  %v1453_v28 = vsel %vm1452_vm1, %v2175_v2, %v1440_v25 }
 0x7f2   :  { %v683_v31 = vadd.f32 1.0, %v1660_v30 }
 0x7f4   :  { %1661 = vrcp.f32 %v683_v31  ;;  %v695_v36 = vand.u32 2147483648, %v683_v31  ;;  %vm689_vm9 = vweird.f32 %v683_v31  ;;  %v693_v37 = vand.u32 2147483647, %v683_v31 }
 0x7f5   :  { %1663 = vpow2.f32 %v1567_v53 }
 0x7f6   :  { %v696_v39 = vor.u32 1.1754944e-38, %v695_v36  ;;  %vm694_vm11 = vcmp.eq.f32.partialorder %v693_v37, 8.507059e+37 }
 0x7fa   :  { %v1662_v32 = vpop.eup %1661 }
 0x7fb   :  { %v685_v20 = vmul.f32 %v1662_v32, %v683_v31  ;;  %vm690_vm8 = vweird.f32 %v1662_v32  ;;  %v1664_v54 = vpop.eup %1663 }
 0x7fc   :  { %vm691_vm10 = vmor %vm689_vm9, %vm690_vm8  ;;  %v622_v55 = vadd.f32 1.0, %v1664_v54 }
 0x7fd   :  { %v686_v33 = vsub.f32 1.0, %v685_v20 }
 0x7fe   :  { %1665 = vrcp.f32 %v622_v55  ;;  %v634_v62 = vand.u32 2147483648, %v622_v55  ;;  %vm628_vm13 = vweird.f32 %v622_v55  ;;  %v632_v63 = vand.u32 2147483647, %v622_v55 }
 0x7ff   :  { %v687_v34 = vmul.f32 %v1662_v32, %v686_v33 }
 0x800   :  { %v635_v3 = vor.u32 1.1754944e-38, %v634_v62  ;;  %vm633_vm15 = vcmp.eq.f32.partialorder %v632_v63, 8.507059e+37 }
 0x801   :  { %v688_v35 = vadd.f32 %v1662_v32, %v687_v34 }
 0x803   :  { %v692_v38 = vsel %vm691_vm10, %v1662_v32, %v688_v35 }
 0x804   :  { %v697_v40 = vsel %vm694_vm11, %v696_v39, %v692_v38  ;;  %v1666_v56 = vpop.eup %1665  ;;  %vm1456_vm11 = vcmask 1045504  }
 0x805   :  { %v624_v57 = vmul.f32 %v1666_v56, %v622_v55  ;;  %vm629_vm12 = vweird.f32 %v1666_v56  ;;  %v703_v11 = vmul.f32 %v701_v48, %v697_v40 }
 0x806   :  { %vm630_vm14 = vmor %vm628_vm13, %vm629_vm12 }
 0x807   :  { %v625_v41 = vsub.f32 1.0, %v624_v57 }
 0x809   :  { %v626_v60 = vmul.f32 %v1666_v56, %v625_v41 }
 0x80b   :  { %v627_v61 = vadd.f32 %v1666_v56, %v626_v60 }
 0x80d   :  { %v631_v0 = vsel %vm630_vm14, %v1666_v56, %v627_v61 }
 0x80e   :  { %v636_v5 = vsel %vm633_vm15, %v635_v3, %v631_v0 }
 0x80f   :  { %v639_v18 = vmul.f32 %v636_v5, %v2208_v7 }
 0x829   :  { %v706_v42 = vpop.permute.xlu0 %705 }
 0x82a   :  { %v708_v47 = vmul.f32 %v706_v42, %v697_v40 }
 0x82c   :  { %710 = vrot.lane.b32.xlu2 %v708_v47, %s1930_s1 }
 0x863   :  { %v642_v13 = vpop.permute.xlu1 %641 }
 0x864   :  { %v644_v10 = vmul.f32 %v642_v13, %v636_v5 }
 0x866   :  { %646 = vrot.lane.b32.xlu0 %v644_v10, %s1930_s1 }
 0x886   :  { %v711_v12 = vpop.permute.xlu2 %710 }
 0x887   :  { %v2239_v14 = vadd.f32 %v711_v12, %v703_v11 }
 0x889   :  { %1667 = vtanh.f32 %v2239_v14 }
 0x88f   :  { %v1668_v58 = vpop.eup %1667 }
 0x890   :  { %716 = vrot.lane.b32.xlu1 %v1668_v58, %s1932_s27 }
 0x8d8   :  { %v647_v19 = vpop.permute.xlu0 %646 }
 0x8d9   :  { %v2244_v21 = vadd.f32 %v647_v19, %v639_v18 }
 0x8db   :  { %1669 = vtanh.f32 %v2244_v21 }
 0x8e1   :  { %v1670_v22 = vpop.eup %1669 }
 0x8e2   :  { %652 = vrot.lane.b32.xlu2 %v1670_v22, %s1932_s27 }
 0x902   :  { %v717_v1 = vpop.permute.xlu1 %716 }
 0x903   :  { %v719_v23 = vmul.f32 %v717_v1, %v697_v40 }
 0x905   :  { %v721_v24 = vrot.slane %v719_v23, 6  ;;  %v851_v23 = vrot.slane %v2239_v14, 6 }
 0x907   :  { %722 = vrot.lane.b32.xlu0 %v721_v24, %s1930_s1 }
 0x93c   :  { %v653_v26 = vpop.permute.xlu2 %652 }
 0x93d   :  { %v655_v27 = vmul.f32 %v653_v26, %v636_v5 }
 0x93f   :  { %v1442_v7 = vrot.slane %v655_v27, 4  ;;  %747 = vrot.lane.b32.xlu1 %v655_v27, %s1930_s1 }
 0x941   :  { %v2254_v29 = vsel %vm1454_vm2, %v1453_v28, %v1442_v7 }
 0x979   :  { %v723_v30 = vpop.permute.xlu0 %722 }
 0x97a   :  { %1570 = vmatmul.msk.f32.vlgmr.msra.gmra.mxu0 %vm143_vm0, %v723_v30  ;;  %1573 = vmatmul.msk.f32.vlgmr.msra.gmra.mxu2 %vm143_vm0, %v723_v30 }
 0x97b   :  { %1123 = vmatpush.msra.mxu0 %v2031_v4  ;;  %1218 = vmatpush.msra.mxu2 %v2110_v49 }
 0x97d   :  { %1124 = vmatpush.msra.mxu0 %v2036_v6  ;;  %1219 = vmatpush.msra.mxu2 %v2112_v50 }
 0x97f   :  { %1125 = vmatpush.msra.mxu0 %v2043_v8  ;;  %1220 = vmatpush.msra.mxu2 %v2116_v51 }
 0x981   :  { %1126 = vmatpush.msra.mxu0 %v2046_v9  ;;  %1221 = vmatpush.msra.mxu2 %v2120_v52 }
 0x9b1   :  { %v748_v2 = vpop.permute.xlu1 %747 }
 0x9b2   :  { %1571 = vmatmul.msk.f32.vlgmr.msrb.gmra.mxu1 %vm143_vm0, %v748_v2 }
 0x9b3   :  { %1193 = vmatpush.msrb.mxu1 %v2085_v43 }
 0x9b5   :  { %1194 = vmatpush.msrb.mxu1 %v2087_v44 }
 0x9b7   :  { %1195 = vmatpush.msrb.mxu1 %v2091_v45 }
 0x9b9   :  { %1196 = vmatpush.msrb.mxu1 %v2097_v46 }
 0x9f7   :  { %v743_v33 = vpop.f32.mrf.mxu0 }
 0x9f8   :  { %v744_v34 = vadd.f32 %v2148_v59, %v743_v33 }
 0x9fd   :  { %v826_v31 = vpop.f32.mrf.mxu2 }
 0x9fe   :  { %v829_v32 = vadd.f32 %v826_v31, %v2273_v16 }
 0xa00   :  { %1671 = vtanh.f32 %v829_v32  ;;  %v1574_v37 = vmul.f32 -1.442695, %v829_v32 }
 0xa06   :  { %v1672_v20 = vpop.eup %1671 }
 0xa07   :  { %855 = vrot.lane.b32.xlu2 %v1672_v20, %s1932_s27 }
 0xa2f   :  { %v768_v35 = vpop.f32.mrf.mxu1 }
 0xa30   :  { %v771_v36 = vadd.f32 %v768_v35, %v744_v34 }
 0xa32   :  { %1673 = vtanh.f32 %v771_v36  ;;  %v1572_v62 = vmul.f32 -1.442695, %v771_v36 }
 0xa33   :  { %1675 = vpow2.f32 %v1574_v37 }
 0xa38   :  { %v1674_v38 = vpop.eup %1673 }
 0xa39   :  { %794 = vrot.lane.b32.xlu0 %v1674_v38, %s1932_s27  ;;  %v1676_v17 = vpop.eup %1675 }
 0xa3a   :  { %v833_v15 = vadd.f32 1.0, %v1676_v17 }
 0xa3c   :  { %1677 = vrcp.f32 %v833_v15  ;;  %v845_v54 = vand.u32 2147483648, %v833_v15  ;;  %vm839_vm4 = vweird.f32 %v833_v15  ;;  %v843_v55 = vand.u32 2147483647, %v833_v15 }
 0xa3d   :  { %1679 = vpow2.f32 %v1572_v62 }
 0xa3e   :  { %v846_v57 = vor.u32 1.1754944e-38, %v845_v54  ;;  %vm844_vm6 = vcmp.eq.f32.partialorder %v843_v55, 8.507059e+37 }
 0xa42   :  { %v1678_v39 = vpop.eup %1677 }
 0xa43   :  { %v835_v40 = vmul.f32 %v1678_v39, %v833_v15  ;;  %vm840_vm3 = vweird.f32 %v1678_v39  ;;  %v1680_v63 = vpop.eup %1679 }
 0xa44   :  { %vm841_vm5 = vmor %vm839_vm4, %vm840_vm3  ;;  %v775_v0 = vadd.f32 1.0, %v1680_v63 }
 0xa45   :  { %v836_v42 = vsub.f32 1.0, %v835_v40 }
 0xa46   :  { %1681 = vrcp.f32 %v775_v0  ;;  %v787_v11 = vand.u32 2147483648, %v775_v0  ;;  %vm781_vm8 = vweird.f32 %v775_v0  ;;  %v785_v12 = vand.u32 2147483647, %v775_v0 }
 0xa47   :  { %v837_v47 = vmul.f32 %v1678_v39, %v836_v42 }
 0xa48   :  { %v788_v18 = vor.u32 1.1754944e-38, %v787_v11  ;;  %vm786_vm10 = vcmp.eq.f32.partialorder %v785_v12, 8.507059e+37 }
 0xa49   :  { %v838_v53 = vadd.f32 %v1678_v39, %v837_v47 }
 0xa4b   :  { %v842_v56 = vsel %vm841_vm5, %v1678_v39, %v838_v53 }
 0xa4c   :  { %v847_v60 = vsel %vm844_vm6, %v846_v57, %v842_v56  ;;  %v1682_v3 = vpop.eup %1681 }
 0xa4d   :  { %v777_v13 = vmul.f32 %v1682_v3, %v775_v0  ;;  %vm782_vm7 = vweird.f32 %v1682_v3  ;;  %v853_v24 = vmul.f32 %v851_v23, %v847_v60 }
 0xa4e   :  { %vm783_vm9 = vmor %vm781_vm8, %vm782_vm7 }
 0xa4f   :  { %v778_v5 = vsub.f32 1.0, %v777_v13 }
 0xa51   :  { %v779_v10 = vmul.f32 %v1682_v3, %v778_v5 }
 0xa53   :  { %v780_v48 = vadd.f32 %v1682_v3, %v779_v10 }
 0xa55   :  { %v784_v58 = vsel %vm783_vm9, %v1682_v3, %v780_v48 }
 0xa56   :  { %v789_v22 = vsel %vm786_vm10, %v788_v18, %v784_v58 }
 0xa57   :  { %v792_v7 = vmul.f32 %v789_v22, %v2244_v21 }
 0xa61   :  { %v856_v41 = vpop.permute.xlu2 %855 }
 0xa62   :  { %v858_v61 = vmul.f32 %v856_v41, %v847_v60 }
 0xa64   :  { %860 = vrot.lane.b32.xlu1 %v858_v61, %s1930_s1 }
 0xaab   :  { %v795_v19 = vpop.permute.xlu0 %794 }
 0xaac   :  { %v797_v1 = vmul.f32 %v795_v19, %v789_v22 }
 0xaae   :  { %799 = vrot.lane.b32.xlu2 %v797_v1, %s1930_s1 }
 0xad6   :  { %v861_v25 = vpop.permute.xlu1 %860 }
 0xad7   :  { %v2282_v26 = vadd.f32 %v861_v25, %v853_v24 }
 0xad9   :  { %1683 = vtanh.f32 %v2282_v26  ;;  %v1003_v12 = vrot.slane %v2282_v26, 6 }
 0xadf   :  { %v1684_v27 = vpop.eup %1683 }
 0xae0   :  { %866 = vrot.lane.b32.xlu0 %v1684_v27, %s1932_s27 }
 0xb08   :  { %v800_v28 = vpop.permute.xlu2 %799 }
 0xb09   :  { %v2287_v30 = vadd.f32 %v800_v28, %v792_v7 }
 0xb0b   :  { %1685 = vtanh.f32 %v2287_v30 }
 0xb11   :  { %v1686_v2 = vpop.eup %1685 }
 0xb12   :  { %805 = vrot.lane.b32.xlu1 %v1686_v2, %s1932_s27 }
 0xb52   :  { %v867_v14 = vpop.permute.xlu0 %866 }
 0xb53   :  { %v869_v31 = vmul.f32 %v867_v14, %v847_v60 }
 0xb55   :  { %871 = vrot.lane.b32.xlu2 %v869_v31, %s1930_s1 }
 0xb84   :  { %v806_v32 = vpop.permute.xlu1 %805 }
 0xb85   :  { %v808_v20 = vmul.f32 %v806_v32, %v789_v22 }
 0xb87   :  { %v1444_v33 = vrot.slane %v808_v20, 2  ;;  %896 = vrot.lane.b32.xlu0 %v808_v20, %s1930_s1 }
 0xb89   :  { %v2295_v21 = vsel %vm1456_vm11, %v2254_v29, %v1444_v33 }
 0xbaf   :  { %v872_v34 = vpop.permute.xlu2 %871 }
 0xbb0   :  { %1575 = vmatmul.msk.f32.vlgmr.msra.gmra.mxu3 %vm143_vm0, %v872_v34  ;;  %1578 = vmatmul.msk.f32.vlgmr.msra.gmra.mxu1 %vm143_vm0, %v872_v34 }
 0xbb1   :  { %1276 = vmatpush.msra.mxu3 %v2031_v4  ;;  %1371 = vmatpush.msra.mxu1 %v2110_v49 }
 0xbb3   :  { %1277 = vmatpush.msra.mxu3 %v2036_v6  ;;  %1372 = vmatpush.msra.mxu1 %v2112_v50 }
 0xbb5   :  { %1278 = vmatpush.msra.mxu3 %v2043_v8  ;;  %1373 = vmatpush.msra.mxu1 %v2116_v51 }
 0xbb7   :  { %1279 = vmatpush.msra.mxu3 %v2046_v9  ;;  %1374 = vmatpush.msra.mxu1 %v2120_v52 }
 0xbf9   :  { %v897_v29 = vpop.permute.xlu0 %896 }
 0xbfa   :  { %1576 = vmatmul.msk.f32.vlgmr.msrb.gmra.mxu0 %vm143_vm0, %v897_v29 }
 0xbfb   :  { %1346 = vmatpush.msrb.mxu0 %v2085_v43 }
 0xbfd   :  { %1347 = vmatpush.msrb.mxu0 %v2087_v44 }
 0xbff   :  { %1348 = vmatpush.msrb.mxu0 %v2091_v45 }
 0xc01   :  { %1349 = vmatpush.msrb.mxu0 %v2097_v46 }
 0xc2d   :  { %v975_v4 = vpop.f32.mrf.mxu1 }
 0xc2e   :  { %v979_v6 = vrot.slane %v975_v4, 6 }
 0xc30   :  { %v981_v8 = vadd.f32 %v979_v6, %v2273_v16 }
 0xc32   :  { %1687 = vtanh.f32 %v981_v8  ;;  %v1579_v43 = vmul.f32 -1.442695, %v981_v8 }
 0xc33   :  { %v892_v9 = vpop.f32.mrf.mxu3 }
 0xc34   :  { %v893_v50 = vadd.f32 %v2148_v59, %v892_v9 }
 0xc38   :  { %v1688_v49 = vpop.eup %1687 }
 0xc39   :  { %1007 = vrot.lane.b32.xlu1 %v1688_v49, %s1932_s27 }
 0xc77   :  { %v917_v51 = vpop.f32.mrf.mxu0 }
 0xc78   :  { %v920_v52 = vadd.f32 %v917_v51, %v893_v50 }
 0xc7a   :  { %1689 = vtanh.f32 %v920_v52  ;;  %v1577_v55 = vmul.f32 -1.442695, %v920_v52 }
 0xc7b   :  { %1691 = vpow2.f32 %v1579_v43 }
 0xc80   :  { %v1690_v44 = vpop.eup %1689 }
 0xc81   :  { %943 = vrot.lane.b32.xlu2 %v1690_v44, %s1932_s27  ;;  %v1692_v45 = vpop.eup %1691 }
 0xc82   :  { %v985_v46 = vadd.f32 1.0, %v1692_v45 }
 0xc84   :  { %1693 = vrcp.f32 %v985_v46  ;;  %v997_v15 = vand.u32 2147483648, %v985_v46  ;;  %vm991_vm13 = vweird.f32 %v985_v46  ;;  %v995_v39 = vand.u32 2147483647, %v985_v46 }
 0xc85   :  { %1695 = vpow2.f32 %v1577_v55 }
 0xc86   :  { %v998_v42 = vor.u32 1.1754944e-38, %v997_v15  ;;  %vm996_vm15 = vcmp.eq.f32.partialorder %v995_v39, 8.507059e+37 }
 0xc8a   :  { %v1694_v35 = vpop.eup %1693 }
 0xc8b   :  { %v987_v36 = vmul.f32 %v1694_v35, %v985_v46  ;;  %vm992_vm12 = vweird.f32 %v1694_v35  ;;  %v1696_v56 = vpop.eup %1695 }
 0xc8c   :  { %vm993_vm14 = vmor %vm991_vm13, %vm992_vm12  ;;  %v924_v57 = vadd.f32 1.0, %v1696_v56 }
 0xc8d   :  { %v988_v37 = vsub.f32 1.0, %v987_v36 }
 0xc8e   :  { %1697 = vrcp.f32 %v924_v57  ;;  %v936_v0 = vand.u32 2147483648, %v924_v57  ;;  %vm930_vm4 = vweird.f32 %v924_v57  ;;  %v934_v3 = vand.u32 2147483647, %v924_v57 }
 0xc8f   :  { %v989_v38 = vmul.f32 %v1694_v35, %v988_v37 }
 0xc90   :  { %v937_v5 = vor.u32 1.1754944e-38, %v936_v0  ;;  %vm935_vm6 = vcmp.eq.f32.partialorder %v934_v3, 8.507059e+37 }
 0xc91   :  { %v990_v17 = vadd.f32 %v1694_v35, %v989_v38 }
 0xc93   :  { %v994_v40 = vsel %vm993_vm14, %v1694_v35, %v990_v17 }
 0xc94   :  { %v999_v47 = vsel %vm996_vm15, %v998_v42, %v994_v40  ;;  %v1698_v41 = vpop.eup %1697 }
 0xc95   :  { %v926_v60 = vmul.f32 %v1698_v41, %v924_v57  ;;  %vm931_vm3 = vweird.f32 %v1698_v41  ;;  %v1005_v58 = vmul.f32 %v1003_v12, %v999_v47 }
 0xc96   :  { %vm932_vm5 = vmor %vm930_vm4, %vm931_vm3 }
 0xc97   :  { %v927_v61 = vsub.f32 1.0, %v926_v60 }
 0xc99   :  { %v928_v62 = vmul.f32 %v1698_v41, %v927_v61 }
 0xc9b   :  { %v929_v63 = vadd.f32 %v1698_v41, %v928_v62 }
 0xc9d   :  { %v933_v13 = vsel %vm932_vm5, %v1698_v41, %v929_v63 }
 0xc9e   :  { %v938_v48 = vsel %vm935_vm6, %v937_v5, %v933_v13 }
 0xc9f   :  { %v941_v1 = vmul.f32 %v938_v48, %v2287_v30 }
 0xcab   :  { %v1008_v53 = vpop.permute.xlu1 %1007 }
 0xcac   :  { %v1010_v54 = vmul.f32 %v1008_v53, %v999_v47 }
 0xcae   :  { %1012 = vrot.lane.b32.xlu0 %v1010_v54, %s1930_s1 }
 0xcdb   :  { %v944_v10 = vpop.permute.xlu2 %943 }
 0xcdc   :  { %v946_v11 = vmul.f32 %v944_v10, %v938_v48 }
 0xcde   :  { %948 = vrot.lane.b32.xlu1 %v946_v11, %s1930_s1 }
 0xd20   :  { %v1013_v18 = vpop.permute.xlu0 %1012 }
 0xd21   :  { %v2319_v19 = vadd.f32 %v1013_v18, %v1005_v58 }
 0xd23   :  { %1699 = vtanh.f32 %v2319_v19  ;;  %v1156_v0 = vrot.slane %v2319_v19, 6 }
 0xd29   :  { %v1700_v22 = vpop.eup %1699 }
 0xd2a   :  { %1018 = vrot.lane.b32.xlu2 %v1700_v22, %s1932_s27 }
 0xd50   :  { %v949_v23 = vpop.permute.xlu1 %948 }
 0xd51   :  { %v2324_v24 = vadd.f32 %v949_v23, %v941_v1 }
 0xd53   :  { %1701 = vtanh.f32 %v2324_v24 }
 0xd59   :  { %v1702_v25 = vpop.eup %1701 }
 0xd5a   :  { %954 = vrot.lane.b32.xlu0 %v1702_v25, %s1932_s27 }
 0xd84   :  { %v1019_v26 = vpop.permute.xlu2 %1018 }
 0xd85   :  { %v1021_v27 = vmul.f32 %v1019_v26, %v999_v47 }
 0xd87   :  { %v1023_v7 = vrot.slane %v1021_v27, 2 }
 0xd89   :  { %1024 = vrot.lane.b32.xlu1 %v1023_v7, %s1930_s1 }
 0xdcc   :  { %v955_v28 = vpop.permute.xlu0 %954 }
 0xdcd   :  { %v2329_v2 = vmul.f32 %v955_v28, %v938_v48 }
 0xdcf   :  { %1049 = vrot.lane.b32.xlu2 %v2329_v2, %s1930_s1 }
 0xdfb   :  { %v1025_v30 = vpop.permute.xlu1 %1024 }
 0xdfc   :  { %1580 = vmatmul.msk.f32.vlgmr.msrb.gmra.mxu2 %vm143_vm0, %v1025_v30  ;;  %1583 = vmatmul.msk.f32.vlgmr.msra.gmra.mxu0 %vm143_vm0, %v1025_v30 }
 0xe29   :  { %v1050_v14 = vpop.permute.xlu2 %1049 }
 0xe2a   :  { %1581 = vmatmul.msk.f32.vlgmr.msrb.gmra.mxu3 %vm143_vm0, %v1050_v14  ;;  %v2365_v14 = vld [vmem:[%s2432_s6] ss:$0 sm:$0xff]  ;;  %s1933_s6 = smov 96  }
 0xe79   :  { %v1128_v31 = vpop.f32.mrf.mxu0 }
 0xe7a   :  { %v1132_v32 = vrot.slane %v1128_v31, 4 }
 0xe7c   :  { %v1134_v20 = vadd.f32 %v1132_v32, %v2273_v16 }
 0xe7e   :  { %1703 = vtanh.f32 %v1134_v20  ;;  %v1584_v49 = vmul.f32 -1.442695, %v1134_v20 }
 0xe7f   :  { %v1045_v34 = vpop.f32.mrf.mxu2 }
 0xe80   :  { %v1046_v29 = vadd.f32 %v2148_v59, %v1045_v34 }
 0xe84   :  { %v1704_v33 = vpop.eup %1703 }
 0xe85   :  { %1160 = vrot.lane.b32.xlu0 %v1704_v33, %s1932_s27 }
 0xead   :  { %v1070_v4 = vpop.f32.mrf.mxu3 }
 0xeae   :  { %v1073_v6 = vadd.f32 %v1070_v4, %v1046_v29 }
 0xeb0   :  { %1705 = vtanh.f32 %v1073_v6  ;;  %v1582_v15 = vmul.f32 -1.442695, %v1073_v6 }
 0xeb1   :  { %1707 = vpow2.f32 %v1584_v49 }
 0xeb6   :  { %v1706_v8 = vpop.eup %1705 }
 0xeb7   :  { %1096 = vrot.lane.b32.xlu1 %v1706_v8, %s1932_s27  ;;  %v1708_v9 = vpop.eup %1707 }
 0xeb8   :  { %v1138_v50 = vadd.f32 1.0, %v1708_v9 }
 0xeba   :  { %1709 = vrcp.f32 %v1138_v50  ;;  %v1150_v46 = vand.u32 2147483648, %v1138_v50  ;;  %vm1144_vm8 = vweird.f32 %v1138_v50  ;;  %v1148_v59 = vand.u32 2147483647, %v1138_v50 }
 0xebb   :  { %1711 = vpow2.f32 %v1582_v15 }
 0xebc   :  { %v1151_v36 = vor.u32 1.1754944e-38, %v1150_v46  ;;  %vm1149_vm10 = vcmp.eq.f32.partialorder %v1148_v59, 8.507059e+37 }
 0xec0   :  { %v1710_v51 = vpop.eup %1709 }
 0xec1   :  { %v1140_v52 = vmul.f32 %v1710_v51, %v1138_v50  ;;  %vm1145_vm7 = vweird.f32 %v1710_v51  ;;  %v1712_v39 = vpop.eup %1711 }
 0xec2   :  { %vm1146_vm9 = vmor %vm1144_vm8, %vm1145_vm7  ;;  %v1077_v40 = vadd.f32 1.0, %v1712_v39 }
 0xec3   :  { %v1141_v43 = vsub.f32 1.0, %v1140_v52 }
 0xec4   :  { %1713 = vrcp.f32 %v1077_v40  ;;  %v1089_v56 = vand.u32 2147483648, %v1077_v40  ;;  %vm1083_vm13 = vweird.f32 %v1077_v40  ;;  %v1087_v57 = vand.u32 2147483647, %v1077_v40 }
 0xec5   :  { %v1142_v44 = vmul.f32 %v1710_v51, %v1141_v43 }
 0xec6   :  { %v1090_v60 = vor.u32 1.1754944e-38, %v1089_v56  ;;  %vm1088_vm15 = vcmp.eq.f32.partialorder %v1087_v57, 8.507059e+37 }
 0xec7   :  { %v1143_v45 = vadd.f32 %v1710_v51, %v1142_v44 }
 0xec9   :  { %v1147_v35 = vsel %vm1146_vm9, %v1710_v51, %v1143_v45 }
 0xeca   :  { %v1152_v38 = vsel %vm1149_vm10, %v1151_v36, %v1147_v35  ;;  %v1714_v42 = vpop.eup %1713 }
 0xecb   :  { %v1079_v47 = vmul.f32 %v1714_v42, %v1077_v40  ;;  %vm1084_vm12 = vweird.f32 %v1714_v42  ;;  %v1158_v3 = vmul.f32 %v1156_v0, %v1152_v38 }
 0xecc   :  { %vm1085_vm14 = vmor %vm1083_vm13, %vm1084_vm12 }
 0xecd   :  { %v1080_v53 = vsub.f32 1.0, %v1079_v47 }
 0xecf   :  { %v1081_v54 = vmul.f32 %v1714_v42, %v1080_v53 }
 0xed1   :  { %v1082_v55 = vadd.f32 %v1714_v42, %v1081_v54 }
 0xed3   :  { %v1086_v41 = vsel %vm1085_vm14, %v1714_v42, %v1082_v55  ;;  %vm1420_vm14 = vcmask 261126  }
 0xed4   :  { %v1091_v62 = vsel %vm1088_vm15, %v1090_v60, %v1086_v41  ;;  %vm1432_vm15 = vcmask 254976  }
 0xed5   :  { %v1094_v48 = vmul.f32 %v1091_v62, %v2324_v24 }
 0xef7   :  { %v1161_v37 = vpop.permute.xlu0 %1160 }
 0xef8   :  { %v1163_v17 = vmul.f32 %v1161_v37, %v1152_v38 }
 0xefa   :  { %1165 = vrot.lane.b32.xlu2 %v1163_v17, %s1930_s1 }
 0xf29   :  { %v1097_v61 = vpop.permute.xlu1 %1096 }
 0xf2a   :  { %v1099_v63 = vmul.f32 %v1097_v61, %v1091_v62 }
 0xf2c   :  { %1101 = vrot.lane.b32.xlu0 %v1099_v63, %s1930_s1 }
 0xf54   :  { %v1166_v13 = vpop.permute.xlu2 %1165 }
 0xf55   :  { %v2343_v5 = vadd.f32 %v1166_v13, %v1158_v3 }
 0xf57   :  { %1715 = vtanh.f32 %v2343_v5  ;;  %v1309_v57 = vrot.slane %v2343_v5, 6 }
 0xf5d   :  { %v1716_v10 = vpop.eup %1715 }
 0xf5e   :  { %1171 = vrot.lane.b32.xlu1 %v1716_v10, %s1932_s27 }
 0xf9e   :  { %v1102_v11 = vpop.permute.xlu0 %1101 }
 0xf9f   :  { %v2348_v12 = vadd.f32 %v1102_v11, %v1094_v48 }
 0xfa1   :  { %1717 = vtanh.f32 %v2348_v12 }
 0xfa7   :  { %v1718_v58 = vpop.eup %1717 }
 0xfa8   :  { %1107 = vrot.lane.b32.xlu2 %v1718_v58, %s1932_s27 }
 0xfd0   :  { %v1172_v18 = vpop.permute.xlu1 %1171 }
 0xfd1   :  { %v1174_v19 = vmul.f32 %v1172_v18, %v1152_v38 }
 0xfd3   :  { %v1176_v22 = vrot.slane %v1174_v19, 4 }
 0xfd5   :  { %1177 = vrot.lane.b32.xlu0 %v1176_v22, %s1930_s1 }
0x1002   :  { %v1108_v1 = vpop.permute.xlu2 %1107 }
0x1003   :  { %v2353_v23 = vmul.f32 %v1108_v1, %v1091_v62 }
0x1005   :  { %1202 = vrot.lane.b32.xlu1 %v2353_v23, %s1930_s1  ;;  %v1446_v11 = vrot.slane %v2353_v23, 6 }
0x1007   :  { %v1458_v19 = vsel %vm1452_vm1, %v2329_v2, %v1446_v11 }
0x1047   :  { %v1178_v24 = vpop.permute.xlu0 %1177 }
0x1048   :  { %1585 = vmatmul.msk.f32.vlgmr.msrb.gmra.mxu1 %vm143_vm0, %v1178_v24  ;;  %1588 = vmatmul.msk.f32.vlgmr.msra.gmra.mxu3 %vm143_vm0, %v1178_v24 }
0x1077   :  { %v1203_v25 = vpop.permute.xlu1 %1202 }
0x1078   :  { %1586 = vmatmul.msk.f32.vlgmr.msra.gmra.mxu2 %vm143_vm0, %v1203_v25 }
0x10c5   :  { %v1198_v30 = vpop.f32.mrf.mxu1 }
0x10c6   :  { %v1199_v31 = vadd.f32 %v2365_v14, %v1198_v30 }
0x10cb   :  { %v1281_v26 = vpop.f32.mrf.mxu3 }
0x10cc   :  { %v1285_v27 = vrot.slane %v1281_v26, 2 }
0x10ce   :  { %v1287_v7 = vadd.f32 %v1285_v27, %v2273_v16 }
0x10d0   :  { %1719 = vtanh.f32 %v1287_v7  ;;  %v1589_v34 = vmul.f32 -1.442695, %v1287_v7 }
0x10d6   :  { %v1720_v28 = vpop.eup %1719 }
0x10d7   :  { %1313 = vrot.lane.b32.xlu2 %v1720_v28, %s1932_s27 }
0x10fb   :  { %v1223_v32 = vpop.f32.mrf.mxu2 }
0x10fc   :  { %v1226_v20 = vadd.f32 %v1223_v32, %v1199_v31  ;;  %v1464_v31 = vld [vmem:[#allocation8 + $0x18] sm:$0xff]  ;;  %v1463_v32 = vld [vmem:[#allocation8 + $0x10] sm:$0xff] }
0x10fd   :  { %1491 = vmatpush.msrb.mxu2 %v1464_v31 }
0x10fe   :  { %1721 = vtanh.f32 %v1226_v20  ;;  %v1587_v59 = vmul.f32 -1.442695, %v1226_v20  ;;  %v1461_v20 = vld [vmem:[#allocation8] sm:$0xff] }
0x10ff   :  { %1723 = vpow2.f32 %v1589_v34  ;;  %1492 = vmatpush.msrb.mxu2 %v1463_v32 }
0x1104   :  { %v1722_v33 = vpop.eup %1721 }
0x1105   :  { %1249 = vrot.lane.b32.xlu0 %v1722_v33, %s1932_s27  ;;  %v1724_v16 = vpop.eup %1723 }
0x1106   :  { %v1291_v29 = vadd.f32 1.0, %v1724_v16 }
0x1108   :  { %1725 = vrcp.f32 %v1291_v29  ;;  %v1303_v50 = vand.u32 2147483648, %v1291_v29  ;;  %vm1297_vm4 = vweird.f32 %v1291_v29  ;;  %v1301_v51 = vand.u32 2147483647, %v1291_v29 }
0x1109   :  { %1727 = vpow2.f32 %v1587_v59 }
0x110a   :  { %v1304_v43 = vor.u32 1.1754944e-38, %v1303_v50  ;;  %vm1302_vm6 = vcmp.eq.f32.partialorder %v1301_v51, 8.507059e+37 }
0x110e   :  { %v1726_v4 = vpop.eup %1725 }
0x110f   :  { %v1293_v6 = vmul.f32 %v1726_v4, %v1291_v29  ;;  %vm1298_vm3 = vweird.f32 %v1726_v4  ;;  %v1728_v35 = vpop.eup %1727 }
0x1110   :  { %vm1299_vm5 = vmor %vm1297_vm4, %vm1298_vm3  ;;  %v1230_v36 = vadd.f32 1.0, %v1728_v35  ;;  %v1614_v35 = vld [vmem:[#allocation10] ss:$0 sm:$0xff] }
0x1111   :  { %v1294_v8 = vsub.f32 1.0, %v1293_v6 }
0x1112   :  { %1729 = vrcp.f32 %v1230_v36  ;;  %v1242_v40 = vand.u32 2147483648, %v1230_v36  ;;  %vm1236_vm8 = vweird.f32 %v1230_v36  ;;  %v1240_v42 = vand.u32 2147483647, %v1230_v36 }
0x1113   :  { %v1295_v49 = vmul.f32 %v1726_v4, %v1294_v8 }
0x1114   :  { %v1243_v53 = vor.u32 1.1754944e-38, %v1242_v40  ;;  %vm1241_vm10 = vcmp.eq.f32.partialorder %v1240_v42, 8.507059e+37 }
0x1115   :  { %v1296_v9 = vadd.f32 %v1726_v4, %v1295_v49 }
0x1117   :  { %v1300_v52 = vsel %vm1299_vm5, %v1726_v4, %v1296_v9 }
0x1118   :  { %v1305_v44 = vsel %vm1302_vm6, %v1304_v43, %v1300_v52  ;;  %v1730_v37 = vpop.eup %1729 }
0x1119   :  { %v1232_v38 = vmul.f32 %v1730_v37, %v1230_v36  ;;  %vm1237_vm7 = vweird.f32 %v1730_v37  ;;  %v1311_v41 = vmul.f32 %v1309_v57, %v1305_v44 }
0x111a   :  { %vm1238_vm9 = vmor %vm1236_vm8, %vm1237_vm7 }
0x111b   :  { %v1233_v17 = vsub.f32 1.0, %v1232_v38 }
0x111d   :  { %v1234_v15 = vmul.f32 %v1730_v37, %v1233_v17 }
0x111f   :  { %v1235_v39 = vadd.f32 %v1730_v37, %v1234_v15 }
0x1121   :  { %v1239_v47 = vsel %vm1238_vm9, %v1730_v37, %v1235_v39 }
0x1122   :  { %v1244_v55 = vsel %vm1241_vm10, %v1243_v53, %v1239_v47 }
0x1123   :  { %v1247_v63 = vmul.f32 %v1244_v55, %v2348_v12 }
0x1131   :  { %v1314_v45 = vpop.permute.xlu2 %1313 }
0x1132   :  { %v1316_v46 = vmul.f32 %v1314_v45, %v1305_v44 }
0x1134   :  { %1318 = vrot.lane.b32.xlu1 %v1316_v46, %s1930_s1 }
0x1177   :  { %v1250_v54 = vpop.permute.xlu0 %1249 }
0x1178   :  { %v1252_v56 = vmul.f32 %v1250_v54, %v1244_v55 }
0x117a   :  { %1254 = vrot.lane.b32.xlu2 %v1252_v56, %s1930_s1 }
0x11a6   :  { %v1319_v60 = vpop.permute.xlu1 %1318 }
0x11a7   :  { %v1321_v61 = vadd.f32 %v1319_v60, %v1311_v41 }
0x11a9   :  { %1731 = vtanh.f32 %v1321_v61 }
0x11af   :  { %v1732_v62 = vpop.eup %1731 }
0x11b0   :  { %1324 = vrot.lane.b32.xlu0 %v1732_v62, %s1932_s27 }
0x11d4   :  { %v1255_v0 = vpop.permute.xlu2 %1254 }
0x11d5   :  { %v2374_v3 = vadd.f32 %v1255_v0, %v1247_v63 }
0x11d7   :  { %1733 = vtanh.f32 %v2374_v3 }
0x11dd   :  { %v1734_v13 = vpop.eup %1733 }
0x11de   :  { %1260 = vrot.lane.b32.xlu1 %v1734_v13, %s1932_s27 }
0x1222   :  { %v1325_v10 = vpop.permute.xlu0 %1324 }
0x1223   :  { %v2378_v48 = vmul.f32 %v1325_v10, %v1305_v44 }
0x1225   :  { %v1329_v5 = vrot.slane %v2378_v48, 6 }
0x1227   :  { %1330 = vrot.lane.b32.xlu2 %v1329_v5, %s1930_s1 }
0x1250   :  { %v1261_v58 = vpop.permute.xlu1 %1260 }
0x1251   :  { %v1263_v18 = vmul.f32 %v1261_v58, %v1244_v55 }
0x1253   :  { %v1448_v12 = vrot.slane %v1263_v18, 4  ;;  %1355 = vrot.lane.b32.xlu0 %v1263_v18, %s1930_s1 }
0x1255   :  { %v2387_v22 = vsel %vm1454_vm2, %v1458_v19, %v1448_v12 }
0x1281   :  { %v1331_v1 = vpop.permute.xlu2 %1330 }
0x1282   :  { %1590 = vmatmul.msk.f32.vlgmr.msrb.gmra.mxu0 %vm143_vm0, %v1331_v1 }
0x12c5   :  { %v1356_v24 = vpop.permute.xlu0 %1355 }
0x12c6   :  { %1591 = vmatmul.msk.f32.vlgmr.msra.gmra.mxu1 %vm143_vm0, %v1356_v24 }
0x12ff   :  { %v1351_v25 = vpop.f32.mrf.mxu0 }
0x1300   :  { %v1352_v23 = vadd.f32 %v2365_v14, %v1351_v25  ;;  %v1462_v14 = vld [vmem:[#allocation8 + $0x8] sm:$0xff] }
0x1301   :  { %1493 = vmatpush.msrb.mxu2 %v1462_v14 }
0x1303   :  { %1494 = vmatpush.msrb.mxu2 %v1461_v20 }
0x1343   :  { %v1376_v26 = vpop.f32.mrf.mxu1 }
0x1344   :  { %v1379_v27 = vadd.f32 %v1376_v26, %v1352_v23 }
0x1346   :  { %1735 = vtanh.f32 %v1379_v27  ;;  %v1592_v2 = vmul.f32 -1.442695, %v1379_v27 }
0x1348   :  { %1737 = vpow2.f32 %v1592_v2 }
0x134c   :  { %v1736_v7 = vpop.eup %1735 }
0x134d   :  { %1402 = vrot.lane.b32.xlu1 %v1736_v7, %s1932_s27 }
0x134e   :  { %v1738_v28 = vpop.eup %1737 }
0x134f   :  { %v1383_v30 = vadd.f32 1.0, %v1738_v28 }
0x1351   :  { %1739 = vrcp.f32 %v1383_v30  ;;  %v1395_v4 = vand.u32 2147483648, %v1383_v30  ;;  %vm1389_vm2 = vweird.f32 %v1383_v30  ;;  %v1393_v6 = vand.u32 2147483647, %v1383_v30 }
0x1353   :  { %v1396_v49 = vor.u32 1.1754944e-38, %v1395_v4  ;;  %vm1394_vm13 = vcmp.eq.f32.partialorder %v1393_v6, 8.507059e+37 }
0x1355   :  { %1471 = vrot.lane.b32.xlu1 %v2295_v21, %s1930_s1 }
0x1357   :  { %v1740_v33 = vpop.eup %1739 }
0x1358   :  { %v1385_v34 = vmul.f32 %v1740_v33, %v1383_v30  ;;  %vm1390_vm1 = vweird.f32 %v1740_v33 }
0x1359   :  { %vm1391_vm12 = vmor %vm1389_vm2, %vm1390_vm1 }
0x135a   :  { %v1386_v16 = vsub.f32 1.0, %v1385_v34 }
0x135c   :  { %v1387_v21 = vmul.f32 %v1740_v33, %v1386_v16 }
0x135d   :  { %1423 = vrot.lane.b32.xlu1 %v1321_v61, %s1933_s6 }
0x135e   :  { %v1388_v29 = vadd.f32 %v1740_v33, %v1387_v21 }
0x1360   :  { %v1392_v8 = vsel %vm1391_vm12, %v1740_v33, %v1388_v29 }
0x1361   :  { %v1397_v50 = vsel %vm1394_vm13, %v1396_v49, %v1392_v8 }
0x1362   :  { %v1400_v44 = vmul.f32 %v1397_v50, %v2374_v3 }
0x13bf   :  { %v1403_v9 = vpop.permute.xlu1 %1402 }
0x13c0   :  { %v1405_v51 = vmul.f32 %v1403_v9, %v1397_v50 }
0x13c2   :  { %1407 = vrot.lane.b32.xlu2 %v1405_v51, %s1930_s1 }
0x13c7   :  { %v1472_v52 = vpop.permute.xlu1 %1471 }
0x13c8   :  { %1593 = vmatmul.msk.f32.vlgmr.msrb.gmra.mxu2 %vm143_vm0, %v1472_v52 }
0x13cf   :  { %v1424_v43 = vpop.permute.xlu1 %1423 }
0x13d0   :  { %1426 = vst.msk [vmem:[#allocation12 - $0x6] sm:$0xc0] %vm1420_vm14, %v1424_v43 }
0x141c   :  { %v1408_v45 = vpop.permute.xlu2 %1407 }
0x141d   :  { %v1410_v46 = vadd.f32 %v1408_v45, %v1400_v44 }
0x141f   :  { %1741 = vtanh.f32 %v1410_v46 }
0x1425   :  { %v1742_v59 = vpop.eup %1741 }
0x1426   :  { %1413 = vrot.lane.b32.xlu0 %v1742_v59, %s1932_s27 }
0x142e   :  { %1417 = vrot.lane.b32.xlu0 %v2378_v48, %s1930_s1 }
0x1436   :  { %1435 = vrot.lane.b32.xlu0 %v1410_v46, %s1933_s6 }
0x144b   :  { %v1496_v36 = vpop.f32.mrf.mxu2 }
0x144c   :  { %v1497_v37 = vadd.f32 %v1614_v35, %v1496_v36 }
0x144e   :  { %1502 = vst [vmem:[%s2437_s11] sm:$0xff] %v1497_v37 }
0x1498   :  { %v1414_v38 = vpop.permute.xlu0 %1413 }
0x1499   :  { %v1416_v17 = vmul.f32 %v1414_v38, %v1397_v50 }
0x149b   :  { %v1450_v15 = vrot.slane %v1416_v17, 2 }
0x149d   :  { %v1460_v39 = vsel %vm1456_vm11, %v2387_v22, %v1450_v15 }
0x149e   :  { %1473 = vrot.lane.b32.xlu2 %v1460_v39, %s1930_s1 }
0x14a0   :  { %v1418_v40 = vpop.permute.xlu0 %1417 }
0x14a1   :  { %1421 = vst.msk [vmem:[#allocation11 - $0x6] sm:$0xc0] %vm1420_vm14, %v1418_v40 }
0x14a6   :  { %1428 = vrot.lane.b32.xlu2 %v1416_v17, %s1930_s1 }
0x14a8   :  { %v1436_v42 = vpop.permute.xlu0 %1435 }
0x14a9   :  { %1439 = vst.msk [vmem:[#allocation12 + $0x2] sm:$0x3] %vm1432_vm15, %v1436_v42 }
0x14aa   :  { %1531 = dma.vmem_to_hbm [thread:$0]  %s1524_s22, 64, %s1526_s24, [#allocation13], %s1930_s1, %s1930_s1, %s1936_s25  }
0x14f8   :  { %v1474_v47 = vpop.permute.xlu2 %1473 }
0x14f9   :  { %1594 = vmatmul.msk.f32.gmra.mxu2 %vm143_vm0, %v1474_v47 }
0x1500   :  { %v1429_v53 = vpop.permute.xlu2 %1428 }
0x1501   :  { %1433 = vst.msk [vmem:[#allocation11 + $0x2] sm:$0x3] %vm1432_vm15, %v1429_v53 }
0x1502   :  { %1518 = dma.vmem_to_hbm [thread:$0]  %s1511_s17, 64, %s1513_s20, [#allocation4], %s1930_s1, %s1930_s1, %s1936_s25  }
0x157c   :  { %v1499_v54 = vpop.f32.mrf.mxu2 }
0x157d   :  { %v1500_v55 = vadd.f32 %v1614_v35, %v1499_v54 }
0x157f   :  { %1503 = vst [vmem:[%s2437_s11 + $0x8] sm:$0xff] %v1500_v55 }
0x1580   :  { %1918 = dma.done.wait [#allocation4], 64  }
0x1581   :  { %1919 = vsyncadd [#allocation4], 4294967232 }
0x1582   :  { %1920 = dma.done.wait [#allocation13], 64  }
0x1583   :  { %1921 = vsyncadd [#allocation13], 4294967232 }
0x1584   :  { %1542 = vsyncpa [#allocation3], 1 }
0x1585   :  { %1543 = vsyncpa [#allocation6], 1 }
0x1586   :  { %1544 = vsyncpa [#allocation9], 1 }
0x1587   :  { %1545 = vsyncpa [#allocation4], 1 }
0x1588   :  { %1546 = vsyncpa [#allocation13], 1 }

</bundles_post_ra>
